<compile_context>
chip_gen: v5e
topology: v5e:2x2
jax: 0.10.0
libtpu: 0.0.40
codegen_flags: <defaults>
</compile_context>

<pallas_src>
import functools

import jax
import jax.numpy as jnp
from jax import lax
from jax.experimental import pallas as pl
from jax.experimental.pallas import tpu as pltpu


# ---------------------------------------------------------------------------
# Parallel kernels: gate-stacked input projection and the FC head
# ---------------------------------------------------------------------------
def _gate_proj_kernel(x_ref, wx_ref, bx_ref, out_ref):
    # x: (TN, D), wx: (3, D, H), bx: (3, 1, H) -> out: (3, TN, H)
    x = x_ref[...]
    wx = wx_ref[...]
    bx = bx_ref[...]
    for g in range(3):
        out_ref[g] = (
            jnp.dot(x, wx[g], preferred_element_type=jnp.float32) + bx[g]
        ).astype(out_ref.dtype)


def _matmul_bias_kernel(x_ref, w_ref, b_ref, o_ref):
    # x: (TN, H), w: (H, O), b: (1, O) -> o: (TN, O)
    o_ref[...] = (
        jnp.dot(x_ref[...], w_ref[...], preferred_element_type=jnp.float32)
        + b_ref[...]
    ).astype(o_ref.dtype)


def _gate_input_projection(x2d, wx, bx, row_tile=512):
    """(N, D) x (3, D, H) -> (3, N, H), row-tiled parallel matmul."""
    N, D = x2d.shape
    H = wx.shape[-1]
    TN = min(N, row_tile)
    return pl.pallas_call(
        _gate_proj_kernel,
        out_shape=jax.ShapeDtypeStruct((3, N, H), jnp.float32),
        grid_spec=pltpu.PrefetchScalarGridSpec(
            num_scalar_prefetch=0,
            grid=(pl.cdiv(N, TN),),
            in_specs=[
                pl.BlockSpec((TN, D), lambda i: (i, 0)),
                pl.BlockSpec((3, D, H), lambda i: (0, 0, 0)),
                pl.BlockSpec((3, 1, H), lambda i: (0, 0, 0)),
            ],
            out_specs=pl.BlockSpec((3, TN, H), lambda i: (0, i, 0)),
        ),
        compiler_params=pltpu.CompilerParams(
            dimension_semantics=("parallel",),
        ),
    )(x2d, wx, bx)


def _linear(x2d, w, b, row_tile=512):
    """(N, H) @ (H, O) + b, row-tiled parallel matmul (the FC head)."""
    N, H = x2d.shape
    O = w.shape[1]
    TN = min(N, row_tile)
    return pl.pallas_call(
        _matmul_bias_kernel,
        out_shape=jax.ShapeDtypeStruct((N, O), jnp.float32),
        grid_spec=pltpu.PrefetchScalarGridSpec(
            num_scalar_prefetch=0,
            grid=(pl.cdiv(N, TN),),
            in_specs=[
                pl.BlockSpec((TN, H), lambda i: (i, 0)),
                pl.BlockSpec((H, O), lambda i: (0, 0)),
                pl.BlockSpec((1, O), lambda i: (0, 0)),
            ],
            out_specs=pl.BlockSpec((TN, O), lambda i: (i, 0)),
        ),
        compiler_params=pltpu.CompilerParams(
            dimension_semantics=("parallel",),
        ),
    )(x2d, w, b.reshape(1, O))


# ---------------------------------------------------------------------------
# Sequential recurrence kernel (all GRU layers, time-chunked)
# ---------------------------------------------------------------------------
def _make_recurrent_kernel(Tc, B, H, num_layers, last_only):
    """Kernel ref order:
      gx (Tc, 3, B, H),
      wh0 (3, H, H), bhn0 (1, H),
      [per deeper layer: wx (3, H, H), wh (3, H, H), bx (3, 1, H), bhn (1, H)],
      y  ((Tc, B, H) or (B, H)),
      h_scratch VMEM (num_layers, B, H)
    """

    def kernel(*refs):
        idx = 0
        gx_ref = refs[idx]; idx += 1
        wh0_ref = refs[idx]; idx += 1
        bhn0_ref = refs[idx]; idx += 1
        deep_refs = []
        for _ in range(num_layers - 1):
            deep_refs.append(refs[idx:idx + 4])
            idx += 4
        y_ref = refs[idx]; idx += 1
        h_ref = refs[idx]; idx += 1

        # Zero-initialise the carried hidden states on the first chunk only.
        @pl.when(pl.program_id(0) == 0)
        def _init():
            h_ref[...] = jnp.zeros_like(h_ref)

        # Hoist loop-invariant weights/biases into vregs (fine at small H).
        wh0 = wh0_ref[...]                                   # (3, H, H)
        bhn0 = bhn0_ref[...]                                 # (1, H)
        deep_w = [(wx[...], wh[...], bx[...], bhn[...])
                  for (wx, wh, bx, bhn) in deep_refs]

        def cell(gx_r, gx_z, gx_n, gh_r, gh_z, gh_n, bhn, h_prev):
            r = jax.nn.sigmoid(gx_r + gh_r)
            z = jax.nn.sigmoid(gx_z + gh_z)
            n = jnp.tanh(gx_n + r * (gh_n + bhn))
            return n + z * (h_prev - n)                      # == (1-z)*n + z*h

        def step(t, hs):
            gx_t = gx_ref[t]                                 # (3, B, H), gate split is free
            h_prev0 = hs[0]
            gh_r = jnp.dot(h_prev0, wh0[0], preferred_element_type=jnp.float32)
            gh_z = jnp.dot(h_prev0, wh0[1], preferred_element_type=jnp.float32)
            gh_n = jnp.dot(h_prev0, wh0[2], preferred_element_type=jnp.float32)
            h = cell(gx_t[0], gx_t[1], gx_t[2], gh_r, gh_z, gh_n, bhn0, h_prev0)
            new_hs = [h]
            for l, (wx, wh, bx, bhn) in enumerate(deep_w):
                h_prev = hs[l + 1]
                gi_r = jnp.dot(h, wx[0], preferred_element_type=jnp.float32) + bx[0]
                gi_z = jnp.dot(h, wx[1], preferred_element_type=jnp.float32) + bx[1]
                gi_n = jnp.dot(h, wx[2], preferred_element_type=jnp.float32) + bx[2]
                gh_r = jnp.dot(h_prev, wh[0], preferred_element_type=jnp.float32)
                gh_z = jnp.dot(h_prev, wh[1], preferred_element_type=jnp.float32)
                gh_n = jnp.dot(h_prev, wh[2], preferred_element_type=jnp.float32)
                h = cell(gi_r, gi_z, gi_n, gh_r, gh_z, gh_n, bhn, h_prev)
                new_hs.append(h)
            if not last_only:
                y_ref[t] = h.astype(y_ref.dtype)
            return tuple(new_hs)

        hs0 = tuple(h_ref[l] for l in range(num_layers))
        hs_final = lax.fori_loop(0, Tc, step, hs0, unroll=True)
        for l in range(num_layers):
            h_ref[l] = hs_final[l]
        if last_only:
            # Output block index is constant across the grid -> last write wins.
            y_ref[...] = hs_final[num_layers - 1].astype(y_ref.dtype)

    return kernel


def _recurrent_forward(gx, layers, last_only, time_chunk):
    """gx: (T, 3, B, H).  Returns (T, B, H) or (B, H) if last_only."""
    T, _, B, H = gx.shape
    num_layers = len(layers)
    Tc = time_chunk
    assert T % Tc == 0

    inputs = [gx, layers[0]["wh"], layers[0]["bhn"]]
    in_specs = [
        pl.BlockSpec((Tc, 3, B, H), lambda i: (i, 0, 0, 0)),
        pl.BlockSpec((3, H, H), lambda i: (0, 0, 0)),
        pl.BlockSpec((1, H), lambda i: (0, 0)),
    ]
    for p in layers[1:]:
        inputs += [p["wx"], p["wh"], p["bx"], p["bhn"]]
        in_specs += [
            pl.BlockSpec((3, H, H), lambda i: (0, 0, 0)),
            pl.BlockSpec((3, H, H), lambda i: (0, 0, 0)),
            pl.BlockSpec((3, 1, H), lambda i: (0, 0, 0)),
            pl.BlockSpec((1, H), lambda i: (0, 0)),
        ]

    if last_only:
        out_shape = jax.ShapeDtypeStruct((B, H), jnp.float32)
        out_specs = pl.BlockSpec((B, H), lambda i: (0, 0))
    else:
        out_shape = jax.ShapeDtypeStruct((T, B, H), jnp.float32)
        out_specs = pl.BlockSpec((Tc, B, H), lambda i: (i, 0, 0))

    kernel = _make_recurrent_kernel(Tc, B, H, num_layers, last_only)
    return pl.pallas_call(
        kernel,
        out_shape=out_shape,
        grid_spec=pltpu.PrefetchScalarGridSpec(
            num_scalar_prefetch=0,
            grid=(T // Tc,),
            in_specs=in_specs,
            out_specs=out_specs,
            scratch_shapes=[pltpu.VMEM((num_layers, B, H), jnp.float32)],
        ),
        compiler_params=pltpu.CompilerParams(
            dimension_semantics=("arbitrary",),
        ),
    )(*inputs)


# ---------------------------------------------------------------------------
# Parameter init (mirrors nn.GRU / nn.Linear, stored in gate-stacked layout)
# ---------------------------------------------------------------------------
def init_gru_model_params(key, input_dim, hidden_dim=32, layer_dim=2, output_dim=1):
    H = hidden_dim
    bound = 1.0 / jnp.sqrt(jnp.float32(H))
    layers = []
    for layer in range(layer_dim):
        in_dim = input_dim if layer == 0 else H
        key, k1, k2, k3, k4 = jax.random.split(key, 5)
        w_ih = jax.random.uniform(k1, (3 * H, in_dim), jnp.float32, -bound, bound)
        w_hh = jax.random.uniform(k2, (3 * H, H), jnp.float32, -bound, bound)
        b_ih = jax.random.uniform(k3, (3 * H,), jnp.float32, -bound, bound)
        b_hh = jax.random.uniform(k4, (3 * H,), jnp.float32, -bound, bound)
        # PyTorch gate order (r, z, n); store transposed and stacked per gate.
        wx = jnp.stack([w_ih[g * H:(g + 1) * H, :].T for g in range(3)], axis=0)
        wh = jnp.stack([w_hh[g * H:(g + 1) * H, :].T for g in range(3)], axis=0)
        bx = jnp.stack([
            (b_ih[0:H] + b_hh[0:H]).reshape(1, H),            # b_ir + b_hr
            (b_ih[H:2 * H] + b_hh[H:2 * H]).reshape(1, H),    # b_iz + b_hz
            b_ih[2 * H:3 * H].reshape(1, H),                  # b_in
        ], axis=0)
        bhn = b_hh[2 * H:3 * H].reshape(1, H)                 # b_hn (inside r*(...))
        layers.append({"wx": wx, "wh": wh, "bx": bx, "bhn": bhn})
    key, k5, k6 = jax.random.split(key, 3)
    fc_w = jax.random.uniform(k5, (H, output_dim), jnp.float32, -bound, bound)
    fc_b = jax.random.uniform(k6, (output_dim,), jnp.float32, -bound, bound)
    return {"layers": layers, "fc_w": fc_w, "fc_b": fc_b}


# ---------------------------------------------------------------------------
# Model forward
# ---------------------------------------------------------------------------
def _pick_time_chunk(T, requested=None):
    if requested is not None and T % requested == 0:
        return requested
    target = requested if requested is not None else 32
    tc = 1
    for c in range(1, min(T, target) + 1):
        if T % c == 0:
            tc = c
    return tc


@functools.partial(jax.jit, static_argnames=("last_timestep_only", "time_chunk"))
def gru_model_forward(x, params, last_timestep_only=False, time_chunk=None):
    """x: (B, T, input_dim) batch-first. Returns (B, T, O) or (B, O)."""
    B, T, D = x.shape
    layers = params["layers"]
    fc_w, fc_b = params["fc_w"], params["fc_b"]
    H = fc_w.shape[0]
    O = fc_w.shape[1]
    Tc = _pick_time_chunk(T, time_chunk)

    x_tm = jnp.transpose(x, (1, 0, 2)).astype(jnp.float32)        # (T, B, D)
    x2d = x_tm.reshape(T * B, D)

    # Hoisted layer-0 input projection, gate-stacked: one parallel matmul kernel.
    gx0 = _gate_input_projection(x2d, layers[0]["wx"], layers[0]["bx"])  # (3, T*B, H)
    gx0 = jnp.transpose(gx0.reshape(3, T, B, H), (1, 0, 2, 3))           # (T, 3, B, H)

    # Time-chunked sequential recurrence over all GRU layers.
    hidden = _recurrent_forward(gx0, layers, last_timestep_only, Tc)

    # FC head hoisted out of the recurrence into a parallel matmul kernel.
    if last_timestep_only:
        return _linear(hidden, fc_w, fc_b)                           # (B, O)
    y2d = _linear(hidden.reshape(T * B, H), fc_w, fc_b)              # (T*B, O)
    return jnp.transpose(y2d.reshape(T, B, O), (1, 0, 2))            # (B, T, O)


# ---------------------------------------------------------------------------
# Pure-JAX reference (for self-check)
# ---------------------------------------------------------------------------
def _reference_forward(x, params, last_timestep_only=False):
    B, T, _ = x.shape
    seq = jnp.transpose(x, (1, 0, 2)).astype(jnp.float32)            # (T, B, D)
    for p in params["layers"]:
        H = p["wh"].shape[-1]
        h = jnp.zeros((B, H), jnp.float32)
        outs = []
        for t in range(T):
            gx_r = seq[t] @ p["wx"][0] + p["bx"][0]
            gx_z = seq[t] @ p["wx"][1] + p["bx"][1]
            gx_n = seq[t] @ p["wx"][2] + p["bx"][2]
            gh_r = h @ p["wh"][0]
            gh_z = h @ p["wh"][1]
            gh_n = h @ p["wh"][2]
            r = jax.nn.sigmoid(gx_r + gh_r)
            z = jax.nn.sigmoid(gx_z + gh_z)
            n = jnp.tanh(gx_n + r * (gh_n + p["bhn"]))
            h = (1.0 - z) * n + z * h
            outs.append(h)
        seq = jnp.stack(outs, axis=0)
    out = jnp.transpose(seq, (1, 0, 2))                              # (B, T, H)
    if last_timestep_only:
        out = out[:, -1, :]
    return out @ params["fc_w"] + params["fc_b"]


if __name__ == "__main__":
    B, T, D, H, L, O = 2, 8, 16, 32, 2, 1
    key = jax.random.PRNGKey(0)
    key, kx, kp = jax.random.split(key, 3)

    x = jax.random.normal(kx, (B, T, D), jnp.float32)
    params = init_gru_model_params(kp, input_dim=D, hidden_dim=H,
                                   layer_dim=L, output_dim=O)

    # Full-sequence output; time_chunk=2 exercises the multi-chunk grid +
    # VMEM-carried hidden state across grid steps.
    y = jax.block_until_ready(
        gru_model_forward(x, params, last_timestep_only=False, time_chunk=2))
    assert y.shape == (B, T, O), y.shape
    y_ref = _reference_forward(x, params, last_timestep_only=False)
    assert jnp.allclose(y, y_ref, atol=1e-4, rtol=1e-4), (
        float(jnp.max(jnp.abs(y - y_ref))))

    # Last-timestep-only path (no full (T,B,H) output materialised).
    y_last = jax.block_until_ready(
        gru_model_forward(x, params, last_timestep_only=True))
    assert y_last.shape == (B, O), y_last.shape
    y_last_ref = _reference_forward(x, params, last_timestep_only=True)
    assert jnp.allclose(y_last, y_last_ref, atol=1e-4, rtol=1e-4), (
        float(jnp.max(jnp.abs(y_last - y_last_ref))))

    print("KERNEL_OK")
</pallas_src>

<mosaic_0001>
module attributes {stable_mosaic.version = 11 : i64} {
  func.func @kernel(%arg0: i32, %arg1: memref<2x3x2x32xf32, #tpu.memory_space<vmem>>, %arg2: memref<3x32x32xf32, #tpu.memory_space<vmem>>, %arg3: memref<1x32xf32, #tpu.memory_space<vmem>>, %arg4: memref<3x32x32xf32, #tpu.memory_space<vmem>>, %arg5: memref<3x32x32xf32, #tpu.memory_space<vmem>>, %arg6: memref<3x1x32xf32, #tpu.memory_space<vmem>>, %arg7: memref<1x32xf32, #tpu.memory_space<vmem>>, %arg8: memref<2x2x32xf32, #tpu.memory_space<vmem>>, %arg9: memref<2x2x32xf32, #tpu.memory_space<vmem>>) attributes {dimension_semantics = [#tpu.dimension_semantics<arbitrary>], iteration_bounds = array<i64: 4>, scalar_prefetch = 0 : i64, scratch_operands = 1 : i64, tpu.core_type = #tpu.core_type<tc>, window_params = [{transform_indices = @transform_0, window_bounds = array<i64: 2, 3, 2, 32>}, {pipeline_mode = #tpu.pipeline_mode<synchronous>, transform_indices = @transform_1, window_bounds = array<i64: 3, 32, 32>}, {pipeline_mode = #tpu.pipeline_mode<synchronous>, transform_indices = @transform_2, window_bounds = array<i64: 1, 32>}, {pipeline_mode = #tpu.pipeline_mode<synchronous>, transform_indices = @transform_3, window_bounds = array<i64: 3, 32, 32>}, {pipeline_mode = #tpu.pipeline_mode<synchronous>, transform_indices = @transform_4, window_bounds = array<i64: 3, 32, 32>}, {pipeline_mode = #tpu.pipeline_mode<synchronous>, transform_indices = @transform_5, window_bounds = array<i64: 3, 1, 32>}, {pipeline_mode = #tpu.pipeline_mode<synchronous>, transform_indices = @transform_6, window_bounds = array<i64: 1, 32>}, {transform_indices = @transform_7, window_bounds = array<i64: 2, 2, 32>}]} {
    %c0_i32 = arith.constant 0 : i32
    %0 = arith.cmpi eq, %arg0, %c0_i32 : i32
    %1 = arith.extui %0 : i1 to i32
    %c0_i32_0 = arith.constant 0 : i32
    %2 = arith.cmpi ne, %1, %c0_i32_0 : i32
    scf.if %2 {
      %cst_63 = arith.constant 0.000000e+00 : f32
      %203 = vector.broadcast %cst_63 : f32 to vector<2x2x32xf32>
      %c0_64 = arith.constant 0 : index
      %c0_65 = arith.constant 0 : index
      %c0_66 = arith.constant 0 : index
      %204 = vector.load %arg9[%c0_64, %c0_65, %c0_66] : memref<2x2x32xf32, #tpu.memory_space<vmem>>, vector<2x2x32xf32>
      tpu.vector_store %arg9[%c0_64, %c0_65, %c0_66], %203 {strides = array<i32>} : memref<2x2x32xf32, #tpu.memory_space<vmem>>, vector<2x2x32xf32>,
    } else {
    }
    %c0 = arith.constant 0 : index
    %c0_1 = arith.constant 0 : index
    %c0_2 = arith.constant 0 : index
    %3 = vector.load %arg2[%c0, %c0_1, %c0_2] : memref<3x32x32xf32, #tpu.memory_space<vmem>>, vector<3x32x32xf32>
    %c0_3 = arith.constant 0 : index
    %c0_4 = arith.constant 0 : index
    %4 = vector.load %arg3[%c0_3, %c0_4] : memref<1x32xf32, #tpu.memory_space<vmem>>, vector<1x32xf32>
    %c0_5 = arith.constant 0 : index
    %c0_6 = arith.constant 0 : index
    %c0_7 = arith.constant 0 : index
    %5 = vector.load %arg4[%c0_5, %c0_6, %c0_7] : memref<3x32x32xf32, #tpu.memory_space<vmem>>, vector<3x32x32xf32>
    %c0_8 = arith.constant 0 : index
    %c0_9 = arith.constant 0 : index
    %c0_10 = arith.constant 0 : index
    %6 = vector.load %arg5[%c0_8, %c0_9, %c0_10] : memref<3x32x32xf32, #tpu.memory_space<vmem>>, vector<3x32x32xf32>
    %c0_11 = arith.constant 0 : index
    %c0_12 = arith.constant 0 : index
    %c0_13 = arith.constant 0 : index
    %7 = vector.load %arg6[%c0_11, %c0_12, %c0_13] : memref<3x1x32xf32, #tpu.memory_space<vmem>>, vector<3x1x32xf32>
    %c0_14 = arith.constant 0 : index
    %c0_15 = arith.constant 0 : index
    %8 = vector.load %arg7[%c0_14, %c0_15] : memref<1x32xf32, #tpu.memory_space<vmem>>, vector<1x32xf32>
    %c0_16 = arith.constant 0 : index
    %c0_17 = arith.constant 0 : index
    %c0_18 = arith.constant 0 : index
    %9 = vector.load %arg9[%c0_16, %c0_17, %c0_18] : memref<2x2x32xf32, #tpu.memory_space<vmem>>, vector<1x2x32xf32>
    %10 = vector.shape_cast %9 : vector<1x2x32xf32> to vector<2x32xf32>
    %c1 = arith.constant 1 : index
    %c0_19 = arith.constant 0 : index
    %c0_20 = arith.constant 0 : index
    %11 = vector.load %arg9[%c1, %c0_19, %c0_20] : memref<2x2x32xf32, #tpu.memory_space<vmem>>, vector<1x2x32xf32>
    %12 = vector.shape_cast %11 : vector<1x2x32xf32> to vector<2x32xf32>
    %c0_i32_21 = arith.constant 0 : i32
    %13 = arith.index_cast %c0_i32_21 : i32 to index
    %c0_22 = arith.constant 0 : index
    %c0_23 = arith.constant 0 : index
    %c0_24 = arith.constant 0 : index
    %14 = vector.load %arg1[%13, %c0_22, %c0_23, %c0_24] : memref<2x3x2x32xf32, #tpu.memory_space<vmem>>, vector<1x3x2x32xf32>
    %15 = vector.shape_cast %14 : vector<1x3x2x32xf32> to vector<3x2x32xf32>
    %16 = vector.extract_strided_slice %3 {offsets = [0, 0, 0], sizes = [1, 32, 32], strides = [1, 1, 1]} : vector<3x32x32xf32> to vector<1x32x32xf32>
    %17 = vector.shape_cast %16 : vector<1x32x32xf32> to vector<32x32xf32>
    %cst = arith.constant dense<0.000000e+00> : vector<2x32xf32>
    %18 = tpu.matmul %10, %17, %cst {dimension_numbers = #tpu.dot_dimension_numbers<[1], [0], [0], [1], [0, 0, 1, 1], [], []>} : vector<2x32xf32>, vector<32x32xf32>, vector<2x32xf32> -> vector<2x32xf32>
    %19 = vector.extract_strided_slice %3 {offsets = [1, 0, 0], sizes = [1, 32, 32], strides = [1, 1, 1]} : vector<3x32x32xf32> to vector<1x32x32xf32>
    %20 = vector.shape_cast %19 : vector<1x32x32xf32> to vector<32x32xf32>
    %cst_25 = arith.constant dense<0.000000e+00> : vector<2x32xf32>
    %21 = tpu.matmul %10, %20, %cst_25 {dimension_numbers = #tpu.dot_dimension_numbers<[1], [0], [0], [1], [0, 0, 1, 1], [], []>} : vector<2x32xf32>, vector<32x32xf32>, vector<2x32xf32> -> vector<2x32xf32>
    %22 = vector.extract_strided_slice %3 {offsets = [2, 0, 0], sizes = [1, 32, 32], strides = [1, 1, 1]} : vector<3x32x32xf32> to vector<1x32x32xf32>
    %23 = vector.shape_cast %22 : vector<1x32x32xf32> to vector<32x32xf32>
    %cst_26 = arith.constant dense<0.000000e+00> : vector<2x32xf32>
    %24 = tpu.matmul %10, %23, %cst_26 {dimension_numbers = #tpu.dot_dimension_numbers<[1], [0], [0], [1], [0, 0, 1, 1], [], []>} : vector<2x32xf32>, vector<32x32xf32>, vector<2x32xf32> -> vector<2x32xf32>
    %25 = vector.extract_strided_slice %15 {offsets = [0, 0, 0], sizes = [1, 2, 32], strides = [1, 1, 1]} : vector<3x2x32xf32> to vector<1x2x32xf32>
    %26 = vector.shape_cast %25 : vector<1x2x32xf32> to vector<2x32xf32>
    %27 = vector.extract_strided_slice %15 {offsets = [1, 0, 0], sizes = [1, 2, 32], strides = [1, 1, 1]} : vector<3x2x32xf32> to vector<1x2x32xf32>
    %28 = vector.shape_cast %27 : vector<1x2x32xf32> to vector<2x32xf32>
    %29 = vector.extract_strided_slice %15 {offsets = [2, 0, 0], sizes = [1, 2, 32], strides = [1, 1, 1]} : vector<3x2x32xf32> to vector<1x2x32xf32>
    %30 = vector.shape_cast %29 : vector<1x2x32xf32> to vector<2x32xf32>
    %31 = arith.addf %26, %18 : vector<2x32xf32>
    %32 = arith.negf %31 : vector<2x32xf32>
    %33 = math.exp %32 : vector<2x32xf32>
    %cst_27 = arith.constant 1.000000e+00 : f32
    %34 = vector.broadcast %cst_27 : f32 to vector<2x32xf32>
    %35 = arith.addf %34, %33 : vector<2x32xf32>
    %36 = arith.divf %34, %35 : vector<2x32xf32>
    %37 = arith.addf %28, %21 : vector<2x32xf32>
    %38 = arith.negf %37 : vector<2x32xf32>
    %39 = math.exp %38 : vector<2x32xf32>
    %cst_28 = arith.constant 1.000000e+00 : f32
    %40 = vector.broadcast %cst_28 : f32 to vector<2x32xf32>
    %41 = arith.addf %40, %39 : vector<2x32xf32>
    %42 = arith.divf %40, %41 : vector<2x32xf32>
    %43 = vector.broadcast %4 : vector<1x32xf32> to vector<2x32xf32>
    %44 = arith.addf %24, %43 : vector<2x32xf32>
    %45 = arith.mulf %36, %44 : vector<2x32xf32>
    %46 = arith.addf %30, %45 : vector<2x32xf32>
    %47 = math.tanh %46 : vector<2x32xf32>
    %48 = arith.subf %10, %47 : vector<2x32xf32>
    %49 = arith.mulf %42, %48 : vector<2x32xf32>
    %50 = arith.addf %47, %49 : vector<2x32xf32>
    %51 = vector.extract_strided_slice %5 {offsets = [0, 0, 0], sizes = [1, 32, 32], strides = [1, 1, 1]} : vector<3x32x32xf32> to vector<1x32x32xf32>
    %52 = vector.shape_cast %51 : vector<1x32x32xf32> to vector<32x32xf32>
    %cst_29 = arith.constant dense<0.000000e+00> : vector<2x32xf32>
    %53 = tpu.matmul %50, %52, %cst_29 {dimension_numbers = #tpu.dot_dimension_numbers<[1], [0], [0], [1], [0, 0, 1, 1], [], []>} : vector<2x32xf32>, vector<32x32xf32>, vector<2x32xf32> -> vector<2x32xf32>
    %54 = vector.extract_strided_slice %7 {offsets = [0, 0, 0], sizes = [1, 1, 32], strides = [1, 1, 1]} : vector<3x1x32xf32> to vector<1x1x32xf32>
    %55 = vector.shape_cast %54 : vector<1x1x32xf32> to vector<1x32xf32>
    %56 = vector.broadcast %55 : vector<1x32xf32> to vector<2x32xf32>
    %57 = arith.addf %53, %56 : vector<2x32xf32>
    %58 = vector.extract_strided_slice %5 {offsets = [1, 0, 0], sizes = [1, 32, 32], strides = [1, 1, 1]} : vector<3x32x32xf32> to vector<1x32x32xf32>
    %59 = vector.shape_cast %58 : vector<1x32x32xf32> to vector<32x32xf32>
    %cst_30 = arith.constant dense<0.000000e+00> : vector<2x32xf32>
    %60 = tpu.matmul %50, %59, %cst_30 {dimension_numbers = #tpu.dot_dimension_numbers<[1], [0], [0], [1], [0, 0, 1, 1], [], []>} : vector<2x32xf32>, vector<32x32xf32>, vector<2x32xf32> -> vector<2x32xf32>
    %61 = vector.extract_strided_slice %7 {offsets = [1, 0, 0], sizes = [1, 1, 32], strides = [1, 1, 1]} : vector<3x1x32xf32> to vector<1x1x32xf32>
    %62 = vector.shape_cast %61 : vector<1x1x32xf32> to vector<1x32xf32>
    %63 = vector.broadcast %62 : vector<1x32xf32> to vector<2x32xf32>
    %64 = arith.addf %60, %63 : vector<2x32xf32>
    %65 = vector.extract_strided_slice %5 {offsets = [2, 0, 0], sizes = [1, 32, 32], strides = [1, 1, 1]} : vector<3x32x32xf32> to vector<1x32x32xf32>
    %66 = vector.shape_cast %65 : vector<1x32x32xf32> to vector<32x32xf32>
    %cst_31 = arith.constant dense<0.000000e+00> : vector<2x32xf32>
    %67 = tpu.matmul %50, %66, %cst_31 {dimension_numbers = #tpu.dot_dimension_numbers<[1], [0], [0], [1], [0, 0, 1, 1], [], []>} : vector<2x32xf32>, vector<32x32xf32>, vector<2x32xf32> -> vector<2x32xf32>
    %68 = vector.extract_strided_slice %7 {offsets = [2, 0, 0], sizes = [1, 1, 32], strides = [1, 1, 1]} : vector<3x1x32xf32> to vector<1x1x32xf32>
    %69 = vector.shape_cast %68 : vector<1x1x32xf32> to vector<1x32xf32>
    %70 = vector.broadcast %69 : vector<1x32xf32> to vector<2x32xf32>
    %71 = arith.addf %67, %70 : vector<2x32xf32>
    %72 = vector.extract_strided_slice %6 {offsets = [0, 0, 0], sizes = [1, 32, 32], strides = [1, 1, 1]} : vector<3x32x32xf32> to vector<1x32x32xf32>
    %73 = vector.shape_cast %72 : vector<1x32x32xf32> to vector<32x32xf32>
    %cst_32 = arith.constant dense<0.000000e+00> : vector<2x32xf32>
    %74 = tpu.matmul %12, %73, %cst_32 {dimension_numbers = #tpu.dot_dimension_numbers<[1], [0], [0], [1], [0, 0, 1, 1], [], []>} : vector<2x32xf32>, vector<32x32xf32>, vector<2x32xf32> -> vector<2x32xf32>
    %75 = vector.extract_strided_slice %6 {offsets = [1, 0, 0], sizes = [1, 32, 32], strides = [1, 1, 1]} : vector<3x32x32xf32> to vector<1x32x32xf32>
    %76 = vector.shape_cast %75 : vector<1x32x32xf32> to vector<32x32xf32>
    %cst_33 = arith.constant dense<0.000000e+00> : vector<2x32xf32>
    %77 = tpu.matmul %12, %76, %cst_33 {dimension_numbers = #tpu.dot_dimension_numbers<[1], [0], [0], [1], [0, 0, 1, 1], [], []>} : vector<2x32xf32>, vector<32x32xf32>, vector<2x32xf32> -> vector<2x32xf32>
    %78 = vector.extract_strided_slice %6 {offsets = [2, 0, 0], sizes = [1, 32, 32], strides = [1, 1, 1]} : vector<3x32x32xf32> to vector<1x32x32xf32>
    %79 = vector.shape_cast %78 : vector<1x32x32xf32> to vector<32x32xf32>
    %cst_34 = arith.constant dense<0.000000e+00> : vector<2x32xf32>
    %80 = tpu.matmul %12, %79, %cst_34 {dimension_numbers = #tpu.dot_dimension_numbers<[1], [0], [0], [1], [0, 0, 1, 1], [], []>} : vector<2x32xf32>, vector<32x32xf32>, vector<2x32xf32> -> vector<2x32xf32>
    %81 = arith.addf %57, %74 : vector<2x32xf32>
    %82 = arith.negf %81 : vector<2x32xf32>
    %83 = math.exp %82 : vector<2x32xf32>
    %cst_35 = arith.constant 1.000000e+00 : f32
    %84 = vector.broadcast %cst_35 : f32 to vector<2x32xf32>
    %85 = arith.addf %84, %83 : vector<2x32xf32>
    %86 = arith.divf %84, %85 : vector<2x32xf32>
    %87 = arith.addf %64, %77 : vector<2x32xf32>
    %88 = arith.negf %87 : vector<2x32xf32>
    %89 = math.exp %88 : vector<2x32xf32>
    %cst_36 = arith.constant 1.000000e+00 : f32
    %90 = vector.broadcast %cst_36 : f32 to vector<2x32xf32>
    %91 = arith.addf %90, %89 : vector<2x32xf32>
    %92 = arith.divf %90, %91 : vector<2x32xf32>
    %93 = vector.broadcast %8 : vector<1x32xf32> to vector<2x32xf32>
    %94 = arith.addf %80, %93 : vector<2x32xf32>
    %95 = arith.mulf %86, %94 : vector<2x32xf32>
    %96 = arith.addf %71, %95 : vector<2x32xf32>
    %97 = math.tanh %96 : vector<2x32xf32>
    %98 = arith.subf %12, %97 : vector<2x32xf32>
    %99 = arith.mulf %92, %98 : vector<2x32xf32>
    %100 = arith.addf %97, %99 : vector<2x32xf32>
    %101 = arith.index_cast %c0_i32_21 : i32 to index
    %c0_37 = arith.constant 0 : index
    %c0_38 = arith.constant 0 : index
    %102 = vector.load %arg8[%101, %c0_37, %c0_38] : memref<2x2x32xf32, #tpu.memory_space<vmem>>, vector<1x2x32xf32>
    %103 = vector.shape_cast %102 : vector<1x2x32xf32> to vector<2x32xf32>
    %104 = vector.shape_cast %100 : vector<2x32xf32> to vector<1x2x32xf32>
    tpu.vector_store %arg8[%101, %c0_37, %c0_38], %104 {strides = array<i32>} : memref<2x2x32xf32, #tpu.memory_space<vmem>>, vector<1x2x32xf32>,
    %c1_i32 = arith.constant 1 : i32
    %105 = arith.index_cast %c1_i32 : i32 to index
    %c0_39 = arith.constant 0 : index
    %c0_40 = arith.constant 0 : index
    %c0_41 = arith.constant 0 : index
    %106 = vector.load %arg1[%105, %c0_39, %c0_40, %c0_41] : memref<2x3x2x32xf32, #tpu.memory_space<vmem>>, vector<1x3x2x32xf32>
    %107 = vector.shape_cast %106 : vector<1x3x2x32xf32> to vector<3x2x32xf32>
    %108 = vector.extract_strided_slice %3 {offsets = [0, 0, 0], sizes = [1, 32, 32], strides = [1, 1, 1]} : vector<3x32x32xf32> to vector<1x32x32xf32>
    %109 = vector.shape_cast %108 : vector<1x32x32xf32> to vector<32x32xf32>
    %cst_42 = arith.constant dense<0.000000e+00> : vector<2x32xf32>
    %110 = tpu.matmul %50, %109, %cst_42 {dimension_numbers = #tpu.dot_dimension_numbers<[1], [0], [0], [1], [0, 0, 1, 1], [], []>} : vector<2x32xf32>, vector<32x32xf32>, vector<2x32xf32> -> vector<2x32xf32>
    %111 = vector.extract_strided_slice %3 {offsets = [1, 0, 0], sizes = [1, 32, 32], strides = [1, 1, 1]} : vector<3x32x32xf32> to vector<1x32x32xf32>
    %112 = vector.shape_cast %111 : vector<1x32x32xf32> to vector<32x32xf32>
    %cst_43 = arith.constant dense<0.000000e+00> : vector<2x32xf32>
    %113 = tpu.matmul %50, %112, %cst_43 {dimension_numbers = #tpu.dot_dimension_numbers<[1], [0], [0], [1], [0, 0, 1, 1], [], []>} : vector<2x32xf32>, vector<32x32xf32>, vector<2x32xf32> -> vector<2x32xf32>
    %114 = vector.extract_strided_slice %3 {offsets = [2, 0, 0], sizes = [1, 32, 32], strides = [1, 1, 1]} : vector<3x32x32xf32> to vector<1x32x32xf32>
    %115 = vector.shape_cast %114 : vector<1x32x32xf32> to vector<32x32xf32>
    %cst_44 = arith.constant dense<0.000000e+00> : vector<2x32xf32>
    %116 = tpu.matmul %50, %115, %cst_44 {dimension_numbers = #tpu.dot_dimension_numbers<[1], [0], [0], [1], [0, 0, 1, 1], [], []>} : vector<2x32xf32>, vector<32x32xf32>, vector<2x32xf32> -> vector<2x32xf32>
    %117 = vector.extract_strided_slice %107 {offsets = [0, 0, 0], sizes = [1, 2, 32], strides = [1, 1, 1]} : vector<3x2x32xf32> to vector<1x2x32xf32>
    %118 = vector.shape_cast %117 : vector<1x2x32xf32> to vector<2x32xf32>
    %119 = vector.extract_strided_slice %107 {offsets = [1, 0, 0], sizes = [1, 2, 32], strides = [1, 1, 1]} : vector<3x2x32xf32> to vector<1x2x32xf32>
    %120 = vector.shape_cast %119 : vector<1x2x32xf32> to vector<2x32xf32>
    %121 = vector.extract_strided_slice %107 {offsets = [2, 0, 0], sizes = [1, 2, 32], strides = [1, 1, 1]} : vector<3x2x32xf32> to vector<1x2x32xf32>
    %122 = vector.shape_cast %121 : vector<1x2x32xf32> to vector<2x32xf32>
    %123 = arith.addf %118, %110 : vector<2x32xf32>
    %124 = arith.negf %123 : vector<2x32xf32>
    %125 = math.exp %124 : vector<2x32xf32>
    %cst_45 = arith.constant 1.000000e+00 : f32
    %126 = vector.broadcast %cst_45 : f32 to vector<2x32xf32>
    %127 = arith.addf %126, %125 : vector<2x32xf32>
    %128 = arith.divf %126, %127 : vector<2x32xf32>
    %129 = arith.addf %120, %113 : vector<2x32xf32>
    %130 = arith.negf %129 : vector<2x32xf32>
    %131 = math.exp %130 : vector<2x32xf32>
    %cst_46 = arith.constant 1.000000e+00 : f32
    %132 = vector.broadcast %cst_46 : f32 to vector<2x32xf32>
    %133 = arith.addf %132, %131 : vector<2x32xf32>
    %134 = arith.divf %132, %133 : vector<2x32xf32>
    %135 = vector.broadcast %4 : vector<1x32xf32> to vector<2x32xf32>
    %136 = arith.addf %116, %135 : vector<2x32xf32>
    %137 = arith.mulf %128, %136 : vector<2x32xf32>
    %138 = arith.addf %122, %137 : vector<2x32xf32>
    %139 = math.tanh %138 : vector<2x32xf32>
    %140 = arith.subf %50, %139 : vector<2x32xf32>
    %141 = arith.mulf %134, %140 : vector<2x32xf32>
    %142 = arith.addf %139, %141 : vector<2x32xf32>
    %143 = vector.extract_strided_slice %5 {offsets = [0, 0, 0], sizes = [1, 32, 32], strides = [1, 1, 1]} : vector<3x32x32xf32> to vector<1x32x32xf32>
    %144 = vector.shape_cast %143 : vector<1x32x32xf32> to vector<32x32xf32>
    %cst_47 = arith.constant dense<0.000000e+00> : vector<2x32xf32>
    %145 = tpu.matmul %142, %144, %cst_47 {dimension_numbers = #tpu.dot_dimension_numbers<[1], [0], [0], [1], [0, 0, 1, 1], [], []>} : vector<2x32xf32>, vector<32x32xf32>, vector<2x32xf32> -> vector<2x32xf32>
    %146 = vector.extract_strided_slice %7 {offsets = [0, 0, 0], sizes = [1, 1, 32], strides = [1, 1, 1]} : vector<3x1x32xf32> to vector<1x1x32xf32>
    %147 = vector.shape_cast %146 : vector<1x1x32xf32> to vector<1x32xf32>
    %148 = vector.broadcast %147 : vector<1x32xf32> to vector<2x32xf32>
    %149 = arith.addf %145, %148 : vector<2x32xf32>
    %150 = vector.extract_strided_slice %5 {offsets = [1, 0, 0], sizes = [1, 32, 32], strides = [1, 1, 1]} : vector<3x32x32xf32> to vector<1x32x32xf32>
    %151 = vector.shape_cast %150 : vector<1x32x32xf32> to vector<32x32xf32>
    %cst_48 = arith.constant dense<0.000000e+00> : vector<2x32xf32>
    %152 = tpu.matmul %142, %151, %cst_48 {dimension_numbers = #tpu.dot_dimension_numbers<[1], [0], [0], [1], [0, 0, 1, 1], [], []>} : vector<2x32xf32>, vector<32x32xf32>, vector<2x32xf32> -> vector<2x32xf32>
    %153 = vector.extract_strided_slice %7 {offsets = [1, 0, 0], sizes = [1, 1, 32], strides = [1, 1, 1]} : vector<3x1x32xf32> to vector<1x1x32xf32>
    %154 = vector.shape_cast %153 : vector<1x1x32xf32> to vector<1x32xf32>
    %155 = vector.broadcast %154 : vector<1x32xf32> to vector<2x32xf32>
    %156 = arith.addf %152, %155 : vector<2x32xf32>
    %157 = vector.extract_strided_slice %5 {offsets = [2, 0, 0], sizes = [1, 32, 32], strides = [1, 1, 1]} : vector<3x32x32xf32> to vector<1x32x32xf32>
    %158 = vector.shape_cast %157 : vector<1x32x32xf32> to vector<32x32xf32>
    %cst_49 = arith.constant dense<0.000000e+00> : vector<2x32xf32>
    %159 = tpu.matmul %142, %158, %cst_49 {dimension_numbers = #tpu.dot_dimension_numbers<[1], [0], [0], [1], [0, 0, 1, 1], [], []>} : vector<2x32xf32>, vector<32x32xf32>, vector<2x32xf32> -> vector<2x32xf32>
    %160 = vector.extract_strided_slice %7 {offsets = [2, 0, 0], sizes = [1, 1, 32], strides = [1, 1, 1]} : vector<3x1x32xf32> to vector<1x1x32xf32>
    %161 = vector.shape_cast %160 : vector<1x1x32xf32> to vector<1x32xf32>
    %162 = vector.broadcast %161 : vector<1x32xf32> to vector<2x32xf32>
    %163 = arith.addf %159, %162 : vector<2x32xf32>
    %164 = vector.extract_strided_slice %6 {offsets = [0, 0, 0], sizes = [1, 32, 32], strides = [1, 1, 1]} : vector<3x32x32xf32> to vector<1x32x32xf32>
    %165 = vector.shape_cast %164 : vector<1x32x32xf32> to vector<32x32xf32>
    %cst_50 = arith.constant dense<0.000000e+00> : vector<2x32xf32>
    %166 = tpu.matmul %100, %165, %cst_50 {dimension_numbers = #tpu.dot_dimension_numbers<[1], [0], [0], [1], [0, 0, 1, 1], [], []>} : vector<2x32xf32>, vector<32x32xf32>, vector<2x32xf32> -> vector<2x32xf32>
    %167 = vector.extract_strided_slice %6 {offsets = [1, 0, 0], sizes = [1, 32, 32], strides = [1, 1, 1]} : vector<3x32x32xf32> to vector<1x32x32xf32>
    %168 = vector.shape_cast %167 : vector<1x32x32xf32> to vector<32x32xf32>
    %cst_51 = arith.constant dense<0.000000e+00> : vector<2x32xf32>
    %169 = tpu.matmul %100, %168, %cst_51 {dimension_numbers = #tpu.dot_dimension_numbers<[1], [0], [0], [1], [0, 0, 1, 1], [], []>} : vector<2x32xf32>, vector<32x32xf32>, vector<2x32xf32> -> vector<2x32xf32>
    %170 = vector.extract_strided_slice %6 {offsets = [2, 0, 0], sizes = [1, 32, 32], strides = [1, 1, 1]} : vector<3x32x32xf32> to vector<1x32x32xf32>
    %171 = vector.shape_cast %170 : vector<1x32x32xf32> to vector<32x32xf32>
    %cst_52 = arith.constant dense<0.000000e+00> : vector<2x32xf32>
    %172 = tpu.matmul %100, %171, %cst_52 {dimension_numbers = #tpu.dot_dimension_numbers<[1], [0], [0], [1], [0, 0, 1, 1], [], []>} : vector<2x32xf32>, vector<32x32xf32>, vector<2x32xf32> -> vector<2x32xf32>
    %173 = arith.addf %149, %166 : vector<2x32xf32>
    %174 = arith.negf %173 : vector<2x32xf32>
    %175 = math.exp %174 : vector<2x32xf32>
    %cst_53 = arith.constant 1.000000e+00 : f32
    %176 = vector.broadcast %cst_53 : f32 to vector<2x32xf32>
    %177 = arith.addf %176, %175 : vector<2x32xf32>
    %178 = arith.divf %176, %177 : vector<2x32xf32>
    %179 = arith.addf %156, %169 : vector<2x32xf32>
    %180 = arith.negf %179 : vector<2x32xf32>
    %181 = math.exp %180 : vector<2x32xf32>
    %cst_54 = arith.constant 1.000000e+00 : f32
    %182 = vector.broadcast %cst_54 : f32 to vector<2x32xf32>
    %183 = arith.addf %182, %181 : vector<2x32xf32>
    %184 = arith.divf %182, %183 : vector<2x32xf32>
    %185 = vector.broadcast %8 : vector<1x32xf32> to vector<2x32xf32>
    %186 = arith.addf %172, %185 : vector<2x32xf32>
    %187 = arith.mulf %178, %186 : vector<2x32xf32>
    %188 = arith.addf %163, %187 : vector<2x32xf32>
    %189 = math.tanh %188 : vector<2x32xf32>
    %190 = arith.subf %100, %189 : vector<2x32xf32>
    %191 = arith.mulf %184, %190 : vector<2x32xf32>
    %192 = arith.addf %189, %191 : vector<2x32xf32>
    %193 = arith.index_cast %c1_i32 : i32 to index
    %c0_55 = arith.constant 0 : index
    %c0_56 = arith.constant 0 : index
    %194 = vector.load %arg8[%193, %c0_55, %c0_56] : memref<2x2x32xf32, #tpu.memory_space<vmem>>, vector<1x2x32xf32>
    %195 = vector.shape_cast %194 : vector<1x2x32xf32> to vector<2x32xf32>
    %196 = vector.shape_cast %192 : vector<2x32xf32> to vector<1x2x32xf32>
    tpu.vector_store %arg8[%193, %c0_55, %c0_56], %196 {strides = array<i32>} : memref<2x2x32xf32, #tpu.memory_space<vmem>>, vector<1x2x32xf32>,
    %c2_i32 = arith.constant 2 : i32
    %c0_57 = arith.constant 0 : index
    %c0_58 = arith.constant 0 : index
    %c0_59 = arith.constant 0 : index
    %197 = vector.load %arg9[%c0_57, %c0_58, %c0_59] : memref<2x2x32xf32, #tpu.memory_space<vmem>>, vector<1x2x32xf32>
    %198 = vector.shape_cast %197 : vector<1x2x32xf32> to vector<2x32xf32>
    %199 = vector.shape_cast %142 : vector<2x32xf32> to vector<1x2x32xf32>
    tpu.vector_store %arg9[%c0_57, %c0_58, %c0_59], %199 {strides = array<i32>} : memref<2x2x32xf32, #tpu.memory_space<vmem>>, vector<1x2x32xf32>,
    %c1_60 = arith.constant 1 : index
    %c0_61 = arith.constant 0 : index
    %c0_62 = arith.constant 0 : index
    %200 = vector.load %arg9[%c1_60, %c0_61, %c0_62] : memref<2x2x32xf32, #tpu.memory_space<vmem>>, vector<1x2x32xf32>
    %201 = vector.shape_cast %200 : vector<1x2x32xf32> to vector<2x32xf32>
    %202 = vector.shape_cast %192 : vector<2x32xf32> to vector<1x2x32xf32>
    tpu.vector_store %arg9[%c1_60, %c0_61, %c0_62], %202 {strides = array<i32>} : memref<2x2x32xf32, #tpu.memory_space<vmem>>, vector<1x2x32xf32>,
    return
  }
  func.func @transform_0(%arg0: i32) -> (i32, i32, i32, i32) {
    %c0_i32 = arith.constant 0 : i32
    %c0_i32_0 = arith.constant 0 : i32
    %c0_i32_1 = arith.constant 0 : i32
    %c0_i32_2 = arith.constant 0 : i32
    return %arg0, %c0_i32, %c0_i32_0, %c0_i32_1 : i32, i32, i32, i32
  }
  func.func @transform_1(%arg0: i32) -> (i32, i32, i32) {
    %c0_i32 = arith.constant 0 : i32
    %c0_i32_0 = arith.constant 0 : i32
    %c0_i32_1 = arith.constant 0 : i32
    %c0_i32_2 = arith.constant 0 : i32
    return %c0_i32, %c0_i32_0, %c0_i32_1 : i32, i32, i32
  }
  func.func @transform_2(%arg0: i32) -> (i32, i32) {
    %c0_i32 = arith.constant 0 : i32
    %c0_i32_0 = arith.constant 0 : i32
    %c0_i32_1 = arith.constant 0 : i32
    return %c0_i32, %c0_i32_0 : i32, i32
  }
  func.func @transform_3(%arg0: i32) -> (i32, i32, i32) {
    %c0_i32 = arith.constant 0 : i32
    %c0_i32_0 = arith.constant 0 : i32
    %c0_i32_1 = arith.constant 0 : i32
    %c0_i32_2 = arith.constant 0 : i32
    return %c0_i32, %c0_i32_0, %c0_i32_1 : i32, i32, i32
  }
  func.func @transform_4(%arg0: i32) -> (i32, i32, i32) {
    %c0_i32 = arith.constant 0 : i32
    %c0_i32_0 = arith.constant 0 : i32
    %c0_i32_1 = arith.constant 0 : i32
    %c0_i32_2 = arith.constant 0 : i32
    return %c0_i32, %c0_i32_0, %c0_i32_1 : i32, i32, i32
  }
  func.func @transform_5(%arg0: i32) -> (i32, i32, i32) {
    %c0_i32 = arith.constant 0 : i32
    %c0_i32_0 = arith.constant 0 : i32
    %c0_i32_1 = arith.constant 0 : i32
    %c0_i32_2 = arith.constant 0 : i32
    return %c0_i32, %c0_i32_0, %c0_i32_1 : i32, i32, i32
  }
  func.func @transform_6(%arg0: i32) -> (i32, i32) {
    %c0_i32 = arith.constant 0 : i32
    %c0_i32_0 = arith.constant 0 : i32
    %c0_i32_1 = arith.constant 0 : i32
    return %c0_i32, %c0_i32_0 : i32, i32
  }
  func.func @transform_7(%arg0: i32) -> (i32, i32, i32) {
    %c0_i32 = arith.constant 0 : i32
    %c0_i32_0 = arith.constant 0 : i32
    %c0_i32_1 = arith.constant 0 : i32
    return %arg0, %c0_i32, %c0_i32_0 : i32, i32, i32
  }
}

module attributes {stable_mosaic.version = 11 : i64} {
  func.func @_gate_proj_kernel(%arg0: i32, %arg1: memref<16x16xf32, #tpu.memory_space<vmem>>, %arg2: memref<3x16x32xf32, #tpu.memory_space<vmem>>, %arg3: memref<3x1x32xf32, #tpu.memory_space<vmem>>, %arg4: memref<3x16x32xf32, #tpu.memory_space<vmem>>) attributes {dimension_semantics = [#tpu.dimension_semantics<parallel>], iteration_bounds = array<i64: 1>, scalar_prefetch = 0 : i64, scratch_operands = 0 : i64, tpu.core_type = #tpu.core_type<tc>, window_params = [{transform_indices = @transform_0, window_bounds = array<i64: 16, 16>}, {pipeline_mode = #tpu.pipeline_mode<synchronous>, transform_indices = @transform_1, window_bounds = array<i64: 3, 16, 32>}, {pipeline_mode = #tpu.pipeline_mode<synchronous>, transform_indices = @transform_2, window_bounds = array<i64: 3, 1, 32>}, {transform_indices = @transform_3, window_bounds = array<i64: 3, 16, 32>}]} {
    %c0 = arith.constant 0 : index
    %c0_0 = arith.constant 0 : index
    %0 = vector.load %arg1[%c0, %c0_0] : memref<16x16xf32, #tpu.memory_space<vmem>>, vector<16x16xf32>
    %c0_1 = arith.constant 0 : index
    %c0_2 = arith.constant 0 : index
    %c0_3 = arith.constant 0 : index
    %1 = vector.load %arg2[%c0_1, %c0_2, %c0_3] : memref<3x16x32xf32, #tpu.memory_space<vmem>>, vector<3x16x32xf32>
    %c0_4 = arith.constant 0 : index
    %c0_5 = arith.constant 0 : index
    %c0_6 = arith.constant 0 : index
    %2 = vector.load %arg3[%c0_4, %c0_5, %c0_6] : memref<3x1x32xf32, #tpu.memory_space<vmem>>, vector<3x1x32xf32>
    %3 = vector.extract_strided_slice %1 {offsets = [0, 0, 0], sizes = [1, 16, 32], strides = [1, 1, 1]} : vector<3x16x32xf32> to vector<1x16x32xf32>
    %4 = vector.shape_cast %3 : vector<1x16x32xf32> to vector<16x32xf32>
    %cst = arith.constant dense<0.000000e+00> : vector<16x32xf32>
    %5 = tpu.matmul %0, %4, %cst {dimension_numbers = #tpu.dot_dimension_numbers<[1], [0], [0], [1], [0, 0, 1, 1], [], []>} : vector<16x16xf32>, vector<16x32xf32>, vector<16x32xf32> -> vector<16x32xf32>
    %6 = vector.extract_strided_slice %2 {offsets = [0, 0, 0], sizes = [1, 1, 32], strides = [1, 1, 1]} : vector<3x1x32xf32> to vector<1x1x32xf32>
    %7 = vector.shape_cast %6 : vector<1x1x32xf32> to vector<1x32xf32>
    %8 = vector.broadcast %7 : vector<1x32xf32> to vector<16x32xf32>
    %9 = arith.addf %5, %8 : vector<16x32xf32>
    %c0_7 = arith.constant 0 : index
    %c0_8 = arith.constant 0 : index
    %c0_9 = arith.constant 0 : index
    %10 = vector.load %arg4[%c0_7, %c0_8, %c0_9] : memref<3x16x32xf32, #tpu.memory_space<vmem>>, vector<1x16x32xf32>
    %11 = vector.shape_cast %10 : vector<1x16x32xf32> to vector<16x32xf32>
    %12 = vector.shape_cast %9 : vector<16x32xf32> to vector<1x16x32xf32>
    tpu.vector_store %arg4[%c0_7, %c0_8, %c0_9], %12 {strides = array<i32>} : memref<3x16x32xf32, #tpu.memory_space<vmem>>, vector<1x16x32xf32>,
    %13 = vector.extract_strided_slice %1 {offsets = [1, 0, 0], sizes = [1, 16, 32], strides = [1, 1, 1]} : vector<3x16x32xf32> to vector<1x16x32xf32>
    %14 = vector.shape_cast %13 : vector<1x16x32xf32> to vector<16x32xf32>
    %cst_10 = arith.constant dense<0.000000e+00> : vector<16x32xf32>
    %15 = tpu.matmul %0, %14, %cst_10 {dimension_numbers = #tpu.dot_dimension_numbers<[1], [0], [0], [1], [0, 0, 1, 1], [], []>} : vector<16x16xf32>, vector<16x32xf32>, vector<16x32xf32> -> vector<16x32xf32>
    %16 = vector.extract_strided_slice %2 {offsets = [1, 0, 0], sizes = [1, 1, 32], strides = [1, 1, 1]} : vector<3x1x32xf32> to vector<1x1x32xf32>
    %17 = vector.shape_cast %16 : vector<1x1x32xf32> to vector<1x32xf32>
    %18 = vector.broadcast %17 : vector<1x32xf32> to vector<16x32xf32>
    %19 = arith.addf %15, %18 : vector<16x32xf32>
    %c1 = arith.constant 1 : index
    %c0_11 = arith.constant 0 : index
    %c0_12 = arith.constant 0 : index
    %20 = vector.load %arg4[%c1, %c0_11, %c0_12] : memref<3x16x32xf32, #tpu.memory_space<vmem>>, vector<1x16x32xf32>
    %21 = vector.shape_cast %20 : vector<1x16x32xf32> to vector<16x32xf32>
    %22 = vector.shape_cast %19 : vector<16x32xf32> to vector<1x16x32xf32>
    tpu.vector_store %arg4[%c1, %c0_11, %c0_12], %22 {strides = array<i32>} : memref<3x16x32xf32, #tpu.memory_space<vmem>>, vector<1x16x32xf32>,
    %23 = vector.extract_strided_slice %1 {offsets = [2, 0, 0], sizes = [1, 16, 32], strides = [1, 1, 1]} : vector<3x16x32xf32> to vector<1x16x32xf32>
    %24 = vector.shape_cast %23 : vector<1x16x32xf32> to vector<16x32xf32>
    %cst_13 = arith.constant dense<0.000000e+00> : vector<16x32xf32>
    %25 = tpu.matmul %0, %24, %cst_13 {dimension_numbers = #tpu.dot_dimension_numbers<[1], [0], [0], [1], [0, 0, 1, 1], [], []>} : vector<16x16xf32>, vector<16x32xf32>, vector<16x32xf32> -> vector<16x32xf32>
    %26 = vector.extract_strided_slice %2 {offsets = [2, 0, 0], sizes = [1, 1, 32], strides = [1, 1, 1]} : vector<3x1x32xf32> to vector<1x1x32xf32>
    %27 = vector.shape_cast %26 : vector<1x1x32xf32> to vector<1x32xf32>
    %28 = vector.broadcast %27 : vector<1x32xf32> to vector<16x32xf32>
    %29 = arith.addf %25, %28 : vector<16x32xf32>
    %c2 = arith.constant 2 : index
    %c0_14 = arith.constant 0 : index
    %c0_15 = arith.constant 0 : index
    %30 = vector.load %arg4[%c2, %c0_14, %c0_15] : memref<3x16x32xf32, #tpu.memory_space<vmem>>, vector<1x16x32xf32>
    %31 = vector.shape_cast %30 : vector<1x16x32xf32> to vector<16x32xf32>
    %32 = vector.shape_cast %29 : vector<16x32xf32> to vector<1x16x32xf32>
    tpu.vector_store %arg4[%c2, %c0_14, %c0_15], %32 {strides = array<i32>} : memref<3x16x32xf32, #tpu.memory_space<vmem>>, vector<1x16x32xf32>,
    return
  }
  func.func @transform_0(%arg0: i32) -> (i32, i32) {
    %c0_i32 = arith.constant 0 : i32
    %c0_i32_0 = arith.constant 0 : i32
    return %arg0, %c0_i32 : i32, i32
  }
  func.func @transform_1(%arg0: i32) -> (i32, i32, i32) {
    %c0_i32 = arith.constant 0 : i32
    %c0_i32_0 = arith.constant 0 : i32
    %c0_i32_1 = arith.constant 0 : i32
    %c0_i32_2 = arith.constant 0 : i32
    return %c0_i32, %c0_i32_0, %c0_i32_1 : i32, i32, i32
  }
  func.func @transform_2(%arg0: i32) -> (i32, i32, i32) {
    %c0_i32 = arith.constant 0 : i32
    %c0_i32_0 = arith.constant 0 : i32
    %c0_i32_1 = arith.constant 0 : i32
    %c0_i32_2 = arith.constant 0 : i32
    return %c0_i32, %c0_i32_0, %c0_i32_1 : i32, i32, i32
  }
  func.func @transform_3(%arg0: i32) -> (i32, i32, i32) {
    %c0_i32 = arith.constant 0 : i32
    %c0_i32_0 = arith.constant 0 : i32
    %c0_i32_1 = arith.constant 0 : i32
    return %c0_i32, %arg0, %c0_i32_0 : i32, i32, i32
  }
}

module attributes {stable_mosaic.version = 11 : i64} {
  func.func @_matmul_bias_kernel(%arg0: i32, %arg1: memref<16x32xf32, #tpu.memory_space<vmem>>, %arg2: memref<32x1xf32, #tpu.memory_space<vmem>>, %arg3: memref<1x1xf32, #tpu.memory_space<vmem>>, %arg4: memref<16x1xf32, #tpu.memory_space<vmem>>) attributes {dimension_semantics = [#tpu.dimension_semantics<parallel>], iteration_bounds = array<i64: 1>, scalar_prefetch = 0 : i64, scratch_operands = 0 : i64, tpu.core_type = #tpu.core_type<tc>, window_params = [{transform_indices = @transform_0, window_bounds = array<i64: 16, 32>}, {pipeline_mode = #tpu.pipeline_mode<synchronous>, transform_indices = @transform_1, window_bounds = array<i64: 32, 1>}, {pipeline_mode = #tpu.pipeline_mode<synchronous>, transform_indices = @transform_2, window_bounds = array<i64: 1, 1>}, {transform_indices = @transform_3, window_bounds = array<i64: 16, 1>}]} {
    %c0 = arith.constant 0 : index
    %c0_0 = arith.constant 0 : index
    %0 = vector.load %arg1[%c0, %c0_0] : memref<16x32xf32, #tpu.memory_space<vmem>>, vector<16x32xf32>
    %c0_1 = arith.constant 0 : index
    %c0_2 = arith.constant 0 : index
    %1 = vector.load %arg2[%c0_1, %c0_2] : memref<32x1xf32, #tpu.memory_space<vmem>>, vector<32x1xf32>
    %cst = arith.constant dense<0.000000e+00> : vector<16x1xf32>
    %2 = tpu.matmul %0, %1, %cst {dimension_numbers = #tpu.dot_dimension_numbers<[1], [0], [0], [1], [0, 0, 1, 1], [], []>} : vector<16x32xf32>, vector<32x1xf32>, vector<16x1xf32> -> vector<16x1xf32>
    %c0_3 = arith.constant 0 : index
    %c0_4 = arith.constant 0 : index
    %3 = vector.load %arg3[%c0_3, %c0_4] : memref<1x1xf32, #tpu.memory_space<vmem>>, vector<1x1xf32>
    %4 = vector.broadcast %3 : vector<1x1xf32> to vector<16x1xf32>
    %5 = arith.addf %2, %4 : vector<16x1xf32>
    %c0_5 = arith.constant 0 : index
    %c0_6 = arith.constant 0 : index
    %6 = vector.load %arg4[%c0_5, %c0_6] : memref<16x1xf32, #tpu.memory_space<vmem>>, vector<16x1xf32>
    tpu.vector_store %arg4[%c0_5, %c0_6], %5 {strides = array<i32>} : memref<16x1xf32, #tpu.memory_space<vmem>>, vector<16x1xf32>,
    return
  }
  func.func @transform_0(%arg0: i32) -> (i32, i32) {
    %c0_i32 = arith.constant 0 : i32
    %c0_i32_0 = arith.constant 0 : i32
    return %arg0, %c0_i32 : i32, i32
  }
  func.func @transform_1(%arg0: i32) -> (i32, i32) {
    %c0_i32 = arith.constant 0 : i32
    %c0_i32_0 = arith.constant 0 : i32
    %c0_i32_1 = arith.constant 0 : i32
    return %c0_i32, %c0_i32_0 : i32, i32
  }
  func.func @transform_2(%arg0: i32) -> (i32, i32) {
    %c0_i32 = arith.constant 0 : i32
    %c0_i32_0 = arith.constant 0 : i32
    %c0_i32_1 = arith.constant 0 : i32
    return %c0_i32, %c0_i32_0 : i32, i32
  }
  func.func @transform_3(%arg0: i32) -> (i32, i32) {
    %c0_i32 = arith.constant 0 : i32
    %c0_i32_0 = arith.constant 0 : i32
    return %arg0, %c0_i32 : i32, i32
  }
}

</mosaic_0001>

<bundles_post_ra>
// kernel: gru_model_forward.3
= control target key start
LH: loop header
LB: loop body
LE: loop exit
PB: predicated region body
PF: predicated region fallthrough
CT: control target
= control target key end

     0   :  { %8 = vsyncpa [#allocation3], 0  ;;  %s184_s15 = smov [#allocation2]   ;;  %s185_s17 = smov 128   ;;  %s255_s0 = inlined_call_operand.vmem [shape: f32[16,16], index: 0, kind: input, shape index: {}]   ;;  %s256_s1 = inlined_call_operand.hbm [shape: f32[3,16,32], index: 1, kind: input, shape index: {}]   ;;  %s257_s2 = inlined_call_operand.vmem [shape: f32[3,1,32], index: 2, kind: input, shape index: {}]   ;;  %s258_s3 = inlined_call_operand.vmem [shape: f32[3,16,32], index: 3, kind: output, shape index: {}]  }
   0x1   :  { %s15_s14 = sshll.u32 %s256_s1, 4  ;;  %s17_s16 = sshll.u32 %s184_s15, 4  ;;  %s16_s14 = int_to_ptr.hbm [resolvable:$true] %s15_s14  ;;  %s18_s16 = int_to_ptr.vmem [resolvable:$true] %s17_s16 }
   0x2   :  { %s186_s18 = smov 8  }
   0x3   :  { %23 = dma.hbm_to_vmem [thread:$0]  %s16_s14, 768, %s18_s16, [#allocation3], %s185_s17, %s185_s17, %s186_s18  }
   0x4   :  { %182 = dma.done.wait [#allocation3], 768  }
   0x5   :  { %183 = vsyncadd [#allocation3], 4294966528  ;;  %v37_v0 = vld [vmem:[#allocation2 + $0x28] sm:$0xff]  ;;  %v36_v1 = vld [vmem:[#allocation2 + $0x20] sm:$0xff]  ;;  %vm44_vm0 = vcmask 130048   ;;  %vm74_vm1 = vcmask 261120  }
   0x6   :  { %v30_v2 = vld [vmem:[%s255_s0] sm:$0xff]  ;;  %123 = vmatpush.msra.mxu2 %v37_v0  ;;  %v35_v3 = vld [vmem:[#allocation2 + $0x18] sm:$0xff]  ;;  %v33_v4 = vld [vmem:[#allocation2 + $0x8] sm:$0xff] }
   0x7   :  { %v34_v5 = vld [vmem:[#allocation2 + $0x10] sm:$0xff]  ;;  %94 = vmatpush.msra.mxu1 %v35_v3  ;;  %150 = vmatpush.msra.mxu3 %v33_v4  ;;  %v32_v6 = vld [vmem:[#allocation2] sm:$0xff]  ;;  %v31_v7 = vld [vmem:[%s255_s0 + $0x8] sm:$0xff] }
   0x8   :  { %124 = vmatpush.msra.mxu2 %v36_v1  ;;  %65 = vmatpush.msra.mxu0 %v33_v4  ;;  %v155_v8 = vld [vmem:[%s257_s2 + $0x1] ss:$0 sm:$0xff]  ;;  %v157_v9 = vld [vmem:[%s257_s2] ss:$0 sm:$0xff]  ;;  %v156_v12 = vld [vmem:[%s257_s2 + $0x2] ss:$0 sm:$0xff] }
   0x9   :  { %146 = vmatmul.msk.f32.vlgmr.msra.gmra.mxu2 %vm44_vm0, %v30_v2  ;;  %95 = vmatpush.msra.mxu1 %v34_v5 }
   0xa   :  { %142 = vmatmul.msk.f32.vlgmr.msra.gmra.mxu1 %vm44_vm0, %v30_v2  ;;  %151 = vmatpush.msra.mxu3 %v32_v6 }
   0xb   :  { %141 = vmatmul.msk.f32.vlgmr.msra.gmra.mxu3 %vm44_vm0, %v31_v7  ;;  %66 = vmatpush.msra.mxu0 %v32_v6 }
   0xc   :  { %140 = vmatmul.msk.f32.vlgmr.msra.gmra.mxu0 %vm44_vm0, %v30_v2 }
  0x11   :  { %147 = vmatmul.msk.f32.gmra.mxu2 %vm44_vm0, %v31_v7 }
  0x12   :  { %143 = vmatmul.msk.f32.gmra.mxu1 %vm44_vm0, %v31_v7 }
  0x87   :  { %v97_v10 = vpop.f32.mrf.mxu1 }
  0x88   :  { %v98_v11 = vadd.f32 %v155_v8, %v97_v10 }
  0x89   :  { %v68_v13 = vpop.f32.mrf.mxu0 }
  0x8a   :  { %144 = vst.msk [vmem:[%s258_s3 + $0x10] sm:$0xff] %vm74_vm1, %v98_v11  ;;  %v69_v14 = vadd.f32 %v157_v9, %v68_v13 }
  0x8c   :  { %v126_v15 = vpop.f32.mrf.mxu2  ;;  %75 = vst.msk [vmem:[%s258_s3] sm:$0xff] %vm74_vm1, %v69_v14 }
  0x8d   :  { %v127_v16 = vadd.f32 %v156_v12, %v126_v15 }
  0x8e   :  { %v71_v17 = vpop.f32.mrf.mxu3 }
  0x8f   :  { %148 = vst.msk [vmem:[%s258_s3 + $0x20] sm:$0xff] %vm74_vm1, %v127_v16  ;;  %v72_v18 = vadd.f32 %v157_v9, %v71_v17  ;;  %v100_v19 = vpop.f32.mrf.mxu1 }
  0x90   :  { %v101_v20 = vadd.f32 %v155_v8, %v100_v19 }
  0x91   :  { %76 = vst.msk [vmem:[%s258_s3 + $0x8] sm:$0xff] %vm74_vm1, %v72_v18 }
  0x92   :  { %145 = vst.msk [vmem:[%s258_s3 + $0x18] sm:$0xff] %vm74_vm1, %v101_v20 }
  0x94   :  { %v129_v21 = vpop.f32.mrf.mxu2 }
  0x95   :  { %v130_v22 = vadd.f32 %v156_v12, %v129_v21 }
  0x97   :  { %149 = vst.msk [vmem:[%s258_s3 + $0x28] sm:$0xff] %vm74_vm1, %v130_v22 }
  0x98   :  { %139 = vsyncpa [#allocation3], 1 }

// kernel: gru_model_forward.5
= control target key start
LH: loop header
LB: loop body
LE: loop exit
PB: predicated region body
PF: predicated region fallthrough
CT: control target
= control target key end

     0   :  { %vm26_vm0 = vcmask 261120   ;;  %vm56_vm1 = vcmask 7168   ;;  %s117_s1 = inlined_call_operand.vmem [shape: f32[32,1], index: 1, kind: input, shape index: {}]   ;;  %s118_s2 = inlined_call_operand.<no memory space> [shape: f32[1,1], index: 2, kind: input, shape index: {}]   ;;  %s119_s0 = inlined_call_operand.vmem [shape: f32[16,32], index: 0, kind: input, shape index: {}]   ;;  %s120_s3 = inlined_call_operand.vmem [shape: f32[16,1], index: 3, kind: output, shape index: {}]  }
   0x1   :  { %v21_v0 = vld [vmem:[%s117_s1 + $0x18] sm:$0xff]  ;;  %v20_v1 = vld [vmem:[%s117_s1 + $0x10] sm:$0xff]  ;;  %v8_v2 = vstv %s118_s2  ;;  %v19_v3 = vld [vmem:[%s117_s1 + $0x8] sm:$0xff] }
   0x2   :  { %45 = vmatpush.msra.mxu0 %v21_v0  ;;  %65 = vmatpush.msra.mxu1 %v21_v0  ;;  %9 = vst [vmem:[#allocation2] sm:$0x1] %v8_v2  ;;  %v18_v4 = vld [vmem:[%s117_s1] sm:$0xff]  ;;  %v17_v6 = vld [vmem:[%s119_s0 + $0x8] sm:$0xff] }
   0x3   :  { %v16_v5 = vld [vmem:[%s119_s0] sm:$0xff] }
   0x4   :  { %46 = vmatpush.msra.mxu0 %v20_v1  ;;  %66 = vmatpush.msra.mxu1 %v20_v1 }
   0x6   :  { %47 = vmatpush.msra.mxu0 %v19_v3  ;;  %67 = vmatpush.msra.mxu1 %v19_v3 }
   0x8   :  { %48 = vmatpush.msra.mxu0 %v18_v4  ;;  %68 = vmatpush.msra.mxu1 %v18_v4 }
   0x9   :  { %63 = vmatmul.msk.f32.vlgmr.msra.gmra.mxu0 %vm26_vm0, %v16_v5  ;;  %64 = vmatmul.msk.f32.vlgmr.msra.gmra.mxu1 %vm26_vm0, %v17_v6  ;;  %v69_v7 = vld [vmem:[#allocation2] ss:$0 sm:$0xff] }
  0x86   :  { %v50_v8 = vpop.f32.mrf.mxu0  ;;  %v53_v9 = vpop.f32.mrf.mxu1 }
  0x87   :  { %v51_v10 = vadd.f32 %v69_v7, %v50_v8  ;;  %v54_v11 = vadd.f32 %v69_v7, %v53_v9 }
  0x89   :  { %57 = vst.msk [vmem:[%s120_s3] sm:$0xff] %vm56_vm1, %v51_v10 }
  0x8a   :  { %58 = vst.msk [vmem:[%s120_s3 + $0x8] sm:$0xff] %vm56_vm1, %v54_v11 }

// kernel: gru_model_forward.4
= control target key start
LH: loop header
LB: loop body
LE: loop exit
PB: predicated region body
PF: predicated region fallthrough
CT: control target
= control target key end

     0   :  { %12 = vsyncpa [#allocation4], 0  ;;  %s1604_s0 = inlined_call_operand.vmem [shape: f32[8,3,2,32], index: 0, kind: input, shape index: {}]   ;;  %s1605_s1 = inlined_call_operand.vmem [shape: f32[3,32,32], index: 1, kind: input, shape index: {}]   ;;  %s1606_s2 = inlined_call_operand.vmem [shape: f32[1,32], index: 2, kind: input, shape index: {}]   ;;  %s1607_s3 = inlined_call_operand.hbm [shape: f32[3,32,32], index: 3, kind: input, shape index: {}]   ;;  %s1608_s4 = inlined_call_operand.hbm [shape: f32[3,32,32], index: 4, kind: input, shape index: {}]   ;;  %s1609_s5 = inlined_call_operand.vmem [shape: f32[3,1,32], index: 5, kind: input, shape index: {}]   ;;  %s1610_s6 = inlined_call_operand.vmem [shape: f32[1,32], index: 6, kind: input, shape index: {}]   ;;  %s1611_s7 = inlined_call_operand.vmem [shape: f32[8,2,32], index: 7, kind: output, shape index: {}]  }
   0x1   :  { %13 = vsyncpa [#allocation6], 0  ;;  %s1281_s24 = smov 0  }
   0x2 LB: > { %s219_s27 = sshll.u32 %s1607_s3, 4  ;;  %s1290_s28 = sadd.s32 4294967295, %s1234_s24   ;;  %s1234_s24 = sphi %s1281_s24, %s19_s24   ;;  %s220_s27 = int_to_ptr.hbm [resolvable:$true] %s219_s27 }
   0x3   : > { %p1038_p0 = scmp.ge.s32.totalorder %s1234_s24, 1  ;;  %p202_p1 = scmp.lt.s32.totalorder %s1234_s24, 5 }
   0x4   : > { %p1039_p2 = scmp.ne.s32.totalorder %s1290_s28, 0  ;;  %p1098_p3 = scmp.eq.s32.totalorder %s1290_s28, 0 }
   0x5   : > { %p1296_p4 = pnand %p1038_p0, %p202_p1  ;;  %s1236_s30 = smov [#allocation3]  }
   0x6   : > { %s221_s8 = sshll.u32 %s1236_s30, 4  ;;  %s233_s11 = sshll.u32 %s1608_s4, 4  ;;  %s222_s8 = int_to_ptr.vmem [resolvable:$true] %s221_s8  ;;  %s234_s11 = int_to_ptr.hbm [resolvable:$true] %s233_s11 }
   0x7   : > { %p1091_p5 = pneg %p1296_p4  ;;  %s1237_s12 = smov [#allocation5]  }
   0x8   : > { %s235_s13 = sshll.u32 %s1237_s12, 4  ;;  %s1238_s14 = smov 128   ;;  %s236_s13 = int_to_ptr.vmem [resolvable:$true] %s235_s13 }
   0x9   : > { %p1092_p6 = pnand %p1098_p3, %p1091_p5  ;;  %s1239_s15 = smov 8  }
   0xa   : > { %267 = sbr.rel (%p1296_p4) target bundleno = 571 (0x23b), region = 48 }
   0xb   : > { %1094 = dma.hbm_to_vmem [thread:$0]  (!%p1092_p6), %s220_s27, 1536, %s222_s8, [#allocation4], %s1238_s14, %s1238_s14, %s1239_s15  }
   0xc   : > { %1097 = dma.hbm_to_vmem [thread:$0]  (!%p1092_p6), %s234_s11, 1536, %s236_s13, [#allocation6], %s1238_s14, %s1238_s14, %s1239_s15  }
   0xf   : > { %1225 = dma.done.wait (%p1098_p3), [#allocation4], 1536  }
  0x10   : > { %1227 = vsyncadd (%p1098_p3), [#allocation4], 4294965760 }
  0x11   : > { %1229 = dma.done.wait (%p1098_p3), [#allocation6], 1536  }
  0x12   : > { %1231 = vsyncadd (%p1098_p3), [#allocation6], 4294965760  ;;  %s1045_s16 = sshll.u32 %s1290_s28, 1 }
  0x13   : > { %p307_p7 = scmp.lt.s32.totalorder %s1045_s16, 7 }
  0x14   : > { %322 = sbr.rel (%p1039_p2) target bundleno = 28 (0x1c), region = 60 }
  0x15   : > { %s1614_s16 = smov (!%p307_p7, %s1045_s16), 7 }
  0x16   : > { %s1082_s17 = smul.u32 6, %s1614_s16  ;;  %s1048_s18 = sshll.u32 %s1614_s16, 1 }
  0x17   : > { %s1321_s21 = scalar_lea.vmem %s1611_s7, %s1048_s18 }
  0x18   : > { %s1326_s25 = scalar_lea.vmem %s1604_s0, %s1082_s17 }
  0x19   : > { %vm323_vm0 = vcmask 254976   ;;  %v1240_v0 = vmov 0.0  }
  0x1a   : > { %324 = vst.msk [vmem:[#allocation2] sm:$0x3] %vm323_vm0, %v1240_v0 }
  0x1b   : > { %325 = vst.msk [vmem:[#allocation2 + $0x2] sm:$0x3] %vm323_vm0, %v1240_v0 }
  0x1c PF: > { %v1333_v1 = vld [vmem:[%s1605_s1 + $0x18] sm:$0xff]  ;;  %v1341_v3 = vld [vmem:[%s1605_s1 + $0x10] sm:$0xff]  ;;  %v1350_v5 = vld [vmem:[%s1605_s1 + $0x8] sm:$0xff]  ;;  %vm373_vm1 = vcmask 261120  }
  0x1d   : > { %v333_v2 = vld [vmem:[%s1605_s1 + $0x38] sm:$0xff]  ;;  %389 = vmatpush.msra.mxu0 %v1333_v1  ;;  %v332_v4 = vld [vmem:[%s1605_s1 + $0x30] sm:$0xff]  ;;  %v1355_v6 = vld [vmem:[%s1605_s1 + $0x28] sm:$0xff] }
  0x1e   : > { %409 = vmatpush.msra.mxu1 %v333_v2  ;;  %v1361_v7 = vld [vmem:[%s1605_s1] sm:$0xff]  ;;  %v1366_v8 = vld [vmem:[%s1605_s1 + $0x58] sm:$0xff]  ;;  %v1371_v9 = vld [vmem:[%s1605_s1 + $0x50] sm:$0xff] }
  0x1f   : > { %390 = vmatpush.msra.mxu0 %v1341_v3  ;;  %v1376_v10 = vld [vmem:[%s1605_s1 + $0x20] sm:$0xff]  ;;  %472 = vmatpush.msra.mxu2 %v1366_v8  ;;  %v1387_v12 = vld [vmem:[%s1605_s1 + $0x48] sm:$0xff]  ;;  %v1409_v23 = vld [vmem:[#allocation5 + $0x10] sm:$0xff] }
  0x20   : > { %410 = vmatpush.msra.mxu1 %v332_v4  ;;  %v1398_v13 = vld [vmem:[%s1605_s1 + $0x40] sm:$0xff]  ;;  %v1412_v24 = vld [vmem:[#allocation5 + $0x8] sm:$0xff]  ;;  %v1428_v31 = vld [vmem:[#allocation3 + $0x10] sm:$0xff] }
  0x21   : > { %v1378_v11 = vld [vmem:[#allocation2] sm:$0x3]  ;;  %391 = vmatpush.msra.mxu0 %v1350_v5  ;;  %473 = vmatpush.msra.mxu2 %v1371_v9  ;;  %v371_v15 = vld [vmem:[%s1326_s25 + $0x2] sm:$0x3]  ;;  %v1415_v25 = vld [vmem:[#allocation5] sm:$0xff] }
  0x22   : > { %411 = vmatpush.msra.mxu1 %v1355_v6  ;;  %v370_v14 = vld [vmem:[%s1326_s25] sm:$0x3]  ;;  %v1418_v26 = vld [vmem:[#allocation2 + $0x2] sm:$0x3]  ;;  %v1430_v32 = vld [vmem:[#allocation3 + $0x30] sm:$0xff] }
  0x23   : > { %392 = vmatpush.msra.mxu0 %v1361_v7  ;;  %474 = vmatpush.msra.mxu2 %v1387_v12  ;;  %v1406_v20 = vld [vmem:[#allocation5 + $0x18] sm:$0xff]  ;;  %v349_v33 = vld [vmem:[#allocation3 + $0x50] sm:$0xff]  ;;  %v1436_v37 = vld [vmem:[#allocation3 + $0x8] sm:$0xff] }
  0x24   : > { %412 = vmatpush.msra.mxu1 %v1376_v10  ;;  %1050 = vmatmul.msk.f32.vlgmr.msra.gmra.mxu0 %vm373_vm1, %v1378_v11  ;;  %v1422_v27 = vld [vmem:[#allocation3 + $0x18] sm:$0xff]  ;;  %v1438_v38 = vld [vmem:[#allocation3 + $0x28] sm:$0xff]  ;;  %v1442_v40 = vld [vmem:[#allocation3] sm:$0xff] }
  0x25   : > { %1051 = vmatmul.msk.f32.vlgmr.msra.gmra.mxu1 %vm373_vm1, %v1378_v11  ;;  %475 = vmatpush.msra.mxu2 %v1398_v13  ;;  %v1424_v28 = vld [vmem:[#allocation3 + $0x38] sm:$0xff]  ;;  %v348_v39 = vld [vmem:[#allocation3 + $0x48] sm:$0xff]  ;;  %v1444_v41 = vld [vmem:[#allocation3 + $0x20] sm:$0xff] }
  0x26   : > { %1054 = vmatmul.msk.f32.vlgmr.msra.gmra.mxu2 %vm373_vm1, %v1378_v11  ;;  %v350_v29 = vld [vmem:[#allocation3 + $0x58] sm:$0xff]  ;;  %504 = vmatpush.msra.mxu3 %v1422_v27  ;;  %v347_v42 = vld [vmem:[#allocation3 + $0x40] sm:$0xff]  ;;  %v1453_v44 = vld [vmem:[#allocation5 + $0x30] sm:$0xff] }
  0x27   : > { %573 = vmatpush.msrb.mxu2 %v1406_v20  ;;  %527 = vmatpush.msrb.mxu0 %v1424_v28  ;;  %v1451_v43 = vld [vmem:[#allocation5 + $0x38] sm:$0xff]  ;;  %v1457_v45 = vld [vmem:[#allocation5 + $0x28] sm:$0xff]  ;;  %v1461_v49 = vld [vmem:[#allocation5 + $0x20] sm:$0xff] }
  0x28   : > { %550 = vmatpush.msrb.mxu1 %v350_v29  ;;  %505 = vmatpush.msra.mxu3 %v1428_v31  ;;  %v1468_v51 = vld [vmem:[%s1606_s2] ss:$0 sm:$0xff]  ;;  %v372_v62 = vld [vmem:[%s1326_s25 + $0x4] sm:$0x3] }
  0x29   : > { %574 = vmatpush.msrb.mxu2 %v1409_v23  ;;  %528 = vmatpush.msrb.mxu0 %v1430_v32 }
  0x2a   : > { %551 = vmatpush.msrb.mxu1 %v349_v33  ;;  %506 = vmatpush.msra.mxu3 %v1436_v37 }
  0x2b   : > { %575 = vmatpush.msrb.mxu2 %v1412_v24  ;;  %529 = vmatpush.msrb.mxu0 %v1438_v38 }
  0x2c   : > { %552 = vmatpush.msrb.mxu1 %v348_v39  ;;  %507 = vmatpush.msra.mxu3 %v1442_v40 }
  0x2d   : > { %576 = vmatpush.msrb.mxu2 %v1415_v25  ;;  %530 = vmatpush.msrb.mxu0 %v1444_v41 }
  0x2e   : > { %1058 = vmatmul.msk.f32.vlgmr.msrb.gmra.mxu2 %vm373_vm1, %v1418_v26  ;;  %553 = vmatpush.msrb.mxu1 %v347_v42 }
  0x2f   : > { %708 = vmatpush.msra.mxu2 %v333_v2  ;;  %593 = vmatpush.msrb.mxu3 %v1451_v43  ;;  %v362_v2 = vld [vmem:[#allocation5 + $0x58] sm:$0xff] }
  0x30   : > { %688 = vmatpush.msra.mxu1 %v1333_v1  ;;  %656 = vmatpush.msra.mxu0 %v362_v2 }
  0x31   : > { %709 = vmatpush.msra.mxu2 %v332_v4  ;;  %594 = vmatpush.msrb.mxu3 %v1453_v44 }
  0x32   : > { %689 = vmatpush.msra.mxu1 %v1341_v3  ;;  %v361_v3 = vld [vmem:[#allocation5 + $0x50] sm:$0xff] }
  0x33   : > { %710 = vmatpush.msra.mxu2 %v1355_v6  ;;  %595 = vmatpush.msrb.mxu3 %v1457_v45 }
  0x34   : > { %690 = vmatpush.msra.mxu1 %v1350_v5  ;;  %v360_v5 = vld [vmem:[#allocation5 + $0x48] sm:$0xff]  ;;  %657 = vmatpush.msra.mxu0 %v361_v3 }
  0x35   : > { %711 = vmatpush.msra.mxu2 %v1376_v10  ;;  %596 = vmatpush.msrb.mxu3 %v1461_v49 }
  0x36   : > { %691 = vmatpush.msra.mxu1 %v1361_v7  ;;  %658 = vmatpush.msra.mxu0 %v360_v5 }
  0x37   : > { %837 = vmatpush.msrb.mxu2 %v350_v29 }
  0x39   : > { %838 = vmatpush.msrb.mxu2 %v349_v33 }
  0x3b   : > { %839 = vmatpush.msrb.mxu2 %v348_v39 }
  0x3d   : > { %840 = vmatpush.msrb.mxu2 %v347_v42 }
  0xa1   : > { %v394_v16 = vpop.f32.mrf.mxu0 }
  0xa2   : > { %v414_v17 = vpop.f32.mrf.mxu1  ;;  %v417_v18 = vadd.f32 %v394_v16, %v370_v14  ;;  %v359_v14 = vld [vmem:[#allocation5 + $0x40] sm:$0xff] }
  0xa3   : > { %v437_v19 = vadd.f32 %v414_v17, %v371_v15  ;;  %659 = vmatpush.msra.mxu0 %v359_v14 }
  0xa4   : > { %v1052_v21 = vmul.f32 -1.442695, %v417_v18 }
  0xa5   : > { %v1053_v22 = vmul.f32 -1.442695, %v437_v19 }
  0xa6   : > { %1120 = vpow2.f32 %v1052_v21 }
  0xa7   : > { %1122 = vpow2.f32 %v1053_v22 }
  0xa9   : > { %v477_v54 = vpop.f32.mrf.mxu2 }
  0xaa   : > { %v478_v58 = vadd.f32 %v1468_v51, %v477_v54  ;;  %v1544_v54 = vld [vmem:[%s1610_s6] ss:$0 sm:$0xff] }
  0xac   : > { %v1121_v30 = vpop.eup %1120 }
  0xad   : > { %v1123_v34 = vpop.eup %1122  ;;  %v421_v35 = vadd.f32 1.0, %v1121_v30 }
  0xae   : > { %v1434_v36 = vadd.f32 1.0, %v1123_v34 }
  0xaf   : > { %1124 = vrcp.f32 %v421_v35  ;;  %v433_v53 = vand.u32 2147483648, %v421_v35  ;;  %v431_v56 = vand.u32 2147483647, %v421_v35  ;;  %vm427_vm3 = vweird.f32 %v421_v35 }
  0xb0   : > { %1126 = vrcp.f32 %v1434_v36  ;;  %vm447_vm6 = vweird.f32 %v1434_v36  ;;  %v453_v6 = vand.u32 2147483648, %v1434_v36  ;;  %v451_v10 = vand.u32 2147483647, %v1434_v36 }
  0xb1   : > { %v434_v60 = vor.u32 1.1754944e-38, %v433_v53  ;;  %vm432_vm5 = vcmp.eq.f32.partialorder %v431_v56, 8.507059e+37 }
  0xb2   : > { %v454_v15 = vor.u32 1.1754944e-38, %v453_v6  ;;  %vm452_vm9 = vcmp.eq.f32.partialorder %v451_v10, 8.507059e+37 }
  0xb5   : > { %v1125_v46 = vpop.eup %1124 }
  0xb6   : > { %v1127_v47 = vpop.eup %1126  ;;  %v423_v48 = vmul.f32 %v1125_v46, %v421_v35  ;;  %vm428_vm2 = vweird.f32 %v1125_v46 }
  0xb7   : > { %v443_v52 = vmul.f32 %v1127_v47, %v1434_v36  ;;  %vm429_vm4 = vmor %vm427_vm3, %vm428_vm2  ;;  %vm448_vm7 = vweird.f32 %v1127_v47 }
  0xb8   : > { %v424_v50 = vsub.f32 1.0, %v423_v48  ;;  %vm449_vm8 = vmor %vm447_vm6, %vm448_vm7 }
  0xb9   : > { %v444_v59 = vsub.f32 1.0, %v443_v52 }
  0xba   : > { %v425_v55 = vmul.f32 %v1125_v46, %v424_v50 }
  0xbb   : > { %v445_v1 = vmul.f32 %v1127_v47, %v444_v59 }
  0xbc   : > { %v426_v57 = vadd.f32 %v1125_v46, %v425_v55 }
  0xbd   : > { %v446_v7 = vadd.f32 %v1127_v47, %v445_v1 }
  0xbe   : > { %v430_v61 = vsel %vm429_vm4, %v1125_v46, %v426_v57 }
  0xbf   : > { %v435_v63 = vsel %vm432_vm5, %v434_v60, %v430_v61  ;;  %v450_v16 = vsel %vm449_vm8, %v1127_v47, %v446_v7 }
  0xc0   : > { %v480_v0 = vmul.f32 %v478_v58, %v435_v63  ;;  %v455_v19 = vsel %vm452_vm9, %v454_v15, %v450_v16 }
  0xc2   : > { %v481_v4 = vadd.f32 %v480_v0, %v372_v62 }
  0xc4   : > { %1128 = vtanh.f32 %v481_v4 }
  0xca   : > { %v1129_v17 = vpop.eup %1128 }
  0xcb   : > { %v483_v18 = vsub.f32 %v1378_v11, %v1129_v17  ;;  %v1522_v11 = vld [vmem:[%s1609_s5] ss:$0 sm:$0xff] }
  0xcd   : > { %v484_v21 = vmul.f32 %v483_v18, %v455_v19 }
  0xcf   : > { %v1479_v22 = vadd.f32 %v1129_v17, %v484_v21 }
  0xd1   : > { %1055 = vmatmul.msk.f32.vlgmr.msra.gmra.mxu3 %vm373_vm1, %v1479_v22  ;;  %1056 = vmatmul.msk.f32.vlgmr.msrb.gmra.mxu0 %vm373_vm1, %v1479_v22 }
  0xd2   : > { %1057 = vmatmul.msk.f32.vlgmr.msrb.gmra.mxu1 %vm373_vm1, %v1479_v22  ;;  %1067 = vmatmul.msk.f32.vlgmr.msra.gmra.mxu2 %vm373_vm1, %v1479_v22 }
  0xd3   : > { %768 = vmatpush.msra.mxu3 %v1366_v8  ;;  %797 = vmatpush.msrb.mxu0 %v1422_v27  ;;  %v578_v8 = vpop.f32.mrf.mxu2 }
  0xd4   : > { %817 = vmatpush.msrb.mxu1 %v1424_v28 }
  0xd5   : > { %769 = vmatpush.msra.mxu3 %v1371_v9  ;;  %798 = vmatpush.msrb.mxu0 %v1428_v31 }
  0xd6   : > { %818 = vmatpush.msrb.mxu1 %v1430_v32 }
  0xd7   : > { %770 = vmatpush.msra.mxu3 %v1387_v12  ;;  %799 = vmatpush.msrb.mxu0 %v1436_v37  ;;  %v1064_v12 = vld [vmem:[%s1326_s25 + $0x8] sm:$0x3] }
  0xd8   : > { %819 = vmatpush.msrb.mxu1 %v1438_v38 }
  0xd9   : > { %1059 = vmatmul.msk.f32.vlgmr.msrb.gmra.mxu3 %vm373_vm1, %v1418_v26  ;;  %1062 = vmatmul.msk.f32.vlgmr.msra.gmra.mxu0 %vm373_vm1, %v1418_v26 }
  0xda   : > { %1066 = vmatmul.msk.f32.vlgmr.msra.gmra.mxu1 %vm373_vm1, %v1479_v22  ;;  %771 = vmatpush.msra.mxu3 %v1398_v13 }
  0xdb   : > { %800 = vmatpush.msrb.mxu0 %v1442_v40  ;;  %820 = vmatpush.msrb.mxu1 %v1444_v41 }
  0xdc   : > { %860 = vmatpush.msrb.mxu3 %v1406_v20 }
  0xdd   : > { %880 = vmatpush.msra.mxu0 %v1451_v43  ;;  %940 = vmatpush.msra.mxu1 %v362_v2  ;;  %v1555_v2 = vld [vmem:[%s1609_s5 + $0x2] ss:$0 sm:$0xff] }
  0xde   : > { %861 = vmatpush.msrb.mxu3 %v1409_v23 }
  0xdf   : > { %881 = vmatpush.msra.mxu0 %v1453_v44  ;;  %941 = vmatpush.msra.mxu1 %v361_v3 }
  0xe0   : > { %862 = vmatpush.msrb.mxu3 %v1412_v24  ;;  %v1063_v24 = vld [vmem:[%s1326_s25 + $0x6] sm:$0x3] }
  0xe1   : > { %882 = vmatpush.msra.mxu0 %v1457_v45  ;;  %1070 = vmatmul.msk.f32.vlgmr.msra.gmra.mxu3 %vm373_vm1, %v1479_v22 }
  0xe2   : > { %942 = vmatpush.msra.mxu1 %v360_v5  ;;  %863 = vmatpush.msrb.mxu3 %v1415_v25  ;;  %v1530_v25 = vld [vmem:[%s1609_s5 + $0x1] ss:$0 sm:$0xff] }
  0xe3   : > { %883 = vmatpush.msra.mxu0 %v1461_v49 }
  0xe4   : > { %943 = vmatpush.msra.mxu1 %v359_v14 }
 0x14e   : > { %v532_v30 = vpop.f32.mrf.mxu0 }
 0x14f   : > { %v1517_v9 = vpop.f32.mrf.mxu1  ;;  %v533_v35 = vadd.f32 %v1530_v25, %v532_v30 }
 0x150   : > { %v556_v21 = vadd.f32 %v1555_v2, %v1517_v9 }
 0x154   : > { %v509_v13 = vpop.f32.mrf.mxu3 }
 0x155   : > { %v510_v20 = vadd.f32 %v1522_v11, %v509_v13  ;;  %v713_v23 = vpop.f32.mrf.mxu2 }
 0x156   : > { %v736_v27 = vadd.f32 %v1064_v12, %v713_v23  ;;  %v661_v58 = vpop.f32.mrf.mxu0 }
 0x157   : > { %v601_v28 = vadd.f32 %v578_v8, %v510_v20  ;;  %v693_v29 = vpop.f32.mrf.mxu1  ;;  %v662_v5 = vadd.f32 %v1544_v54, %v661_v58  ;;  %v1065_v8 = vld [vmem:[%s1326_s25 + $0xa] sm:$0x3] }
 0x158   : > { %v1069_v31 = vmul.f32 -1.442695, %v736_v27  ;;  %v716_v32 = vadd.f32 %v1063_v24, %v693_v29 }
 0x159   : > { %v1060_v33 = vmul.f32 -1.442695, %v601_v28 }
 0x15a   : > { %1130 = vpow2.f32 %v1069_v31  ;;  %v1068_v34 = vmul.f32 -1.442695, %v716_v32 }
 0x15b   : > { %1132 = vpow2.f32 %v1060_v33 }
 0x15c   : > { %1134 = vpow2.f32 %v1068_v34  ;;  %v598_v36 = vpop.f32.mrf.mxu3 }
 0x15d   : > { %v621_v37 = vadd.f32 %v598_v36, %v533_v35 }
 0x15f   : > { %v1061_v38 = vmul.f32 -1.442695, %v621_v37 }
 0x160   : > { %v1131_v39 = vpop.eup %1130 }
 0x161   : > { %v1133_v40 = vpop.eup %1132  ;;  %1136 = vpow2.f32 %v1061_v38  ;;  %v1533_v43 = vadd.f32 1.0, %v1131_v39 }
 0x162   : > { %v1135_v41 = vpop.eup %1134  ;;  %v605_v42 = vadd.f32 1.0, %v1133_v40 }
 0x163   : > { %v720_v44 = vadd.f32 1.0, %v1135_v41  ;;  %v752_v30 = vand.u32 2147483648, %v1533_v43  ;;  %vm746_vm6 = vweird.f32 %v1533_v43  ;;  %v750_v32 = vand.u32 2147483647, %v1533_v43 }
 0x164   : > { %1138 = vrcp.f32 %v605_v42  ;;  %v615_v56 = vand.u32 2147483647, %v605_v42  ;;  %v617_v57 = vand.u32 2147483648, %v605_v42  ;;  %v773_v3 = vpop.f32.mrf.mxu3  ;;  %vm611_vm12 = vweird.f32 %v605_v42 }
 0x165   : > { %1140 = vrcp.f32 %v720_v44  ;;  %v732_v61 = vand.u32 2147483648, %v720_v44  ;;  %v730_v1 = vand.u32 2147483647, %v720_v44  ;;  %vm726_vm13 = vweird.f32 %v720_v44 }
 0x166   : > { %1142 = vrcp.f32 %v1533_v43  ;;  %v618_v10 = vor.u32 1.1754944e-38, %v617_v57  ;;  %vm616_vm0 = vcmp.eq.f32.partialorder %v615_v56, 8.507059e+37  ;;  %v774_v18 = vadd.f32 %v1468_v51, %v773_v3 }
 0x167   : > { %v1137_v45 = vpop.eup %1136  ;;  %v733_v15 = vor.u32 1.1754944e-38, %v732_v61  ;;  %vm731_vm2 = vcmp.eq.f32.partialorder %v730_v1, 8.507059e+37  ;;  %v753_v38 = vor.u32 1.1754944e-38, %v752_v30 }
 0x168   : > { %v1536_v46 = vadd.f32 1.0, %v1137_v45 }
 0x16a   : > { %v1139_v47 = vpop.eup %1138  ;;  %1144 = vrcp.f32 %v1536_v46  ;;  %v637_v9 = vand.u32 2147483648, %v1536_v46  ;;  %vm631_vm5 = vweird.f32 %v1536_v46  ;;  %v635_v31 = vand.u32 2147483647, %v1536_v46 }
 0x16b   : > { %v607_v48 = vmul.f32 %v1139_v47, %v605_v42  ;;  %v1141_v49 = vpop.eup %1140  ;;  %vm612_vm10 = vweird.f32 %v1139_v47 }
 0x16c   : > { %v1539_v50 = vpop.eup %1142  ;;  %v722_v52 = vmul.f32 %v1141_v49, %v720_v44  ;;  %vm727_vm11 = vweird.f32 %v1141_v49  ;;  %vm613_vm14 = vmor %vm611_vm12, %vm612_vm10  ;;  %v638_v35 = vor.u32 1.1754944e-38, %v637_v9  ;;  %vm636_vm9 = vcmp.eq.f32.partialorder %v635_v31, 8.507059e+37 }
 0x16d   : > { %v608_v53 = vsub.f32 1.0, %v607_v48  ;;  %v742_v60 = vmul.f32 %v1539_v50, %v1533_v43  ;;  %vm728_vm15 = vmor %vm726_vm13, %vm727_vm11  ;;  %vm747_vm4 = vweird.f32 %v1539_v50  ;;  %vm751_vm10 = vcmp.eq.f32.partialorder %v750_v32, 8.507059e+37 }
 0x16e   : > { %v723_v55 = vsub.f32 1.0, %v722_v52  ;;  %vm748_vm8 = vmor %vm746_vm6, %vm747_vm4  ;;  %vm670_vm11 = vcmask 254976  }
 0x16f   : > { %v609_v62 = vmul.f32 %v1139_v47, %v608_v53  ;;  %v743_v14 = vsub.f32 1.0, %v742_v60 }
 0x170   : > { %v1546_v59 = vpop.eup %1144  ;;  %v724_v0 = vmul.f32 %v1141_v49, %v723_v55 }
 0x171   : > { %v627_v63 = vmul.f32 %v1546_v59, %v1536_v46  ;;  %v610_v4 = vadd.f32 %v1139_v47, %v609_v62  ;;  %v744_v24 = vmul.f32 %v1539_v50, %v743_v14  ;;  %vm632_vm3 = vweird.f32 %v1546_v59 }
 0x172   : > { %v725_v7 = vadd.f32 %v1141_v49, %v724_v0  ;;  %vm633_vm7 = vmor %vm631_vm5, %vm632_vm3 }
 0x173   : > { %v628_v6 = vsub.f32 1.0, %v627_v63  ;;  %v614_v16 = vsel %vm613_vm14, %v1139_v47, %v610_v4  ;;  %v745_v51 = vadd.f32 %v1539_v50, %v744_v24 }
 0x174   : > { %v729_v17 = vsel %vm728_vm15, %v1141_v49, %v725_v7  ;;  %v619_v19 = vsel %vm616_vm0, %v618_v10, %v614_v16 }
 0x175   : > { %v734_v12 = vsel %vm731_vm2, %v733_v15, %v729_v17  ;;  %v664_v13 = vmul.f32 %v662_v5, %v619_v19  ;;  %v629_v20 = vmul.f32 %v1546_v59, %v628_v6  ;;  %v749_v36 = vsel %vm748_vm8, %v1539_v50, %v745_v51 }
 0x176   : > { %v776_v23 = vmul.f32 %v774_v18, %v734_v12  ;;  %v754_v42 = vsel %vm751_vm10, %v753_v38, %v749_v36 }
 0x177   : > { %v665_v27 = vadd.f32 %v664_v13, %v556_v21  ;;  %v630_v29 = vadd.f32 %v1546_v59, %v629_v20 }
 0x178   : > { %v777_v28 = vadd.f32 %v1065_v8, %v776_v23 }
 0x179   : > { %1146 = vtanh.f32 %v665_v27  ;;  %v634_v33 = vsel %vm633_vm7, %v1546_v59, %v630_v29 }
 0x17a   : > { %1148 = vtanh.f32 %v777_v28  ;;  %v639_v41 = vsel %vm636_vm9, %v638_v35, %v634_v33 }
 0x17f   : > { %v1147_v34 = vpop.eup %1146 }
 0x180   : > { %v1149_v37 = vpop.eup %1148  ;;  %v667_v39 = vsub.f32 %v1418_v26, %v1147_v34 }
 0x181   : > { %v779_v40 = vsub.f32 %v1479_v22, %v1149_v37 }
 0x182   : > { %v668_v43 = vmul.f32 %v667_v39, %v639_v41 }
 0x183   : > { %v780_v44 = vmul.f32 %v779_v40, %v754_v42 }
 0x184   : > { %v1578_v45 = vadd.f32 %v1147_v34, %v668_v43 }
 0x185   : > { %v781_v46 = vadd.f32 %v1149_v37, %v780_v44 }
 0x186   : > { %1074 = vmatmul.msk.f32.vlgmr.msrb.gmra.mxu3 %vm373_vm1, %v1578_v45  ;;  %671 = vst.msk [vmem:[%s1321_s21] sm:$0x3] %vm670_vm11, %v1578_v45 }
 0x187   : > { %1071 = vmatmul.msk.f32.vlgmr.msrb.gmra.mxu0 %vm373_vm1, %v781_v46  ;;  %956 = vst.msk [vmem:[#allocation2] sm:$0x3] %vm670_vm11, %v781_v46  ;;  %1072 = vmatmul.msk.f32.vlgmr.msrb.gmra.mxu1 %vm373_vm1, %v781_v46 }
 0x188   : > { %1073 = vmatmul.msk.f32.vlgmr.msrb.gmra.mxu2 %vm373_vm1, %v781_v46 }
 0x18f   : > { %1075 = vmatmul.msk.f32.vlgmr.msra.gmra.mxu0 %vm373_vm1, %v1578_v45  ;;  %1078 = vmatmul.msk.f32.vlgmr.msra.gmra.mxu1 %vm373_vm1, %v1578_v45 }
 0x204   : > { %v802_v26 = vpop.f32.mrf.mxu0  ;;  %v822_v47 = vpop.f32.mrf.mxu1 }
 0x205   : > { %v803_v22 = vadd.f32 %v1522_v11, %v802_v26  ;;  %v823_v50 = vadd.f32 %v1530_v25, %v822_v47 }
 0x209   : > { %v865_v48 = vpop.f32.mrf.mxu3 }
 0x20a   : > { %v888_v49 = vadd.f32 %v865_v48, %v803_v22 }
 0x20b   : > { %v842_v6 = vpop.f32.mrf.mxu2 }
 0x20c   : > { %v1076_v52 = vmul.f32 -1.442695, %v888_v49  ;;  %v885_v53 = vpop.f32.mrf.mxu0  ;;  %v945_v4 = vpop.f32.mrf.mxu1  ;;  %v843_v17 = vadd.f32 %v1555_v2, %v842_v6 }
 0x20d   : > { %v908_v55 = vadd.f32 %v885_v53, %v823_v50  ;;  %v946_v15 = vadd.f32 %v1544_v54, %v945_v4 }
 0x20e   : > { %1150 = vpow2.f32 %v1076_v52 }
 0x20f   : > { %v1077_v56 = vmul.f32 -1.442695, %v908_v55 }
 0x211   : > { %1152 = vpow2.f32 %v1077_v56 }
 0x214   : > { %v1151_v57 = vpop.eup %1150 }
 0x215   : > { %v892_v58 = vadd.f32 1.0, %v1151_v57 }
 0x217   : > { %v1153_v59 = vpop.eup %1152  ;;  %1154 = vrcp.f32 %v892_v58  ;;  %v904_v1 = vand.u32 2147483648, %v892_v58  ;;  %v902_v25 = vand.u32 2147483647, %v892_v58  ;;  %vm898_vm12 = vweird.f32 %v892_v58 }
 0x218   : > { %v912_v60 = vadd.f32 1.0, %v1153_v59 }
 0x219   : > { %v905_v10 = vor.u32 1.1754944e-38, %v904_v1  ;;  %vm903_vm14 = vcmp.eq.f32.partialorder %v902_v25, 8.507059e+37 }
 0x21a   : > { %1156 = vrcp.f32 %v912_v60  ;;  %v924_v12 = vand.u32 2147483648, %v912_v60  ;;  %vm918_vm0 = vweird.f32 %v912_v60  ;;  %v922_v13 = vand.u32 2147483647, %v912_v60 }
 0x21c   : > { %v925_v24 = vor.u32 1.1754944e-38, %v924_v12  ;;  %vm923_vm3 = vcmp.eq.f32.partialorder %v922_v13, 8.507059e+37 }
 0x21d   : > { %v1155_v61 = vpop.eup %1154 }
 0x21e   : > { %v894_v62 = vmul.f32 %v1155_v61, %v892_v58  ;;  %vm899_vm1 = vweird.f32 %v1155_v61 }
 0x21f   : > { %vm900_vm13 = vmor %vm898_vm12, %vm899_vm1 }
 0x220   : > { %v1157_v11 = vpop.eup %1156  ;;  %v895_v63 = vsub.f32 1.0, %v894_v62 }
 0x221   : > { %v914_v0 = vmul.f32 %v1157_v11, %v912_v60  ;;  %vm919_vm15 = vweird.f32 %v1157_v11 }
 0x222   : > { %v896_v3 = vmul.f32 %v1155_v61, %v895_v63  ;;  %vm920_vm2 = vmor %vm918_vm0, %vm919_vm15 }
 0x223   : > { %v915_v7 = vsub.f32 1.0, %v914_v0 }
 0x224   : > { %v897_v5 = vadd.f32 %v1155_v61, %v896_v3 }
 0x225   : > { %v916_v19 = vmul.f32 %v1157_v11, %v915_v7 }
 0x226   : > { %v901_v14 = vsel %vm900_vm13, %v1155_v61, %v897_v5 }
 0x227   : > { %v906_v16 = vsel %vm903_vm14, %v905_v10, %v901_v14  ;;  %v917_v8 = vadd.f32 %v1157_v11, %v916_v19 }
 0x228   : > { %v948_v18 = vmul.f32 %v946_v15, %v906_v16 }
 0x229   : > { %v921_v20 = vsel %vm920_vm2, %v1157_v11, %v917_v8 }
 0x22a   : > { %v949_v21 = vadd.f32 %v948_v18, %v843_v17  ;;  %v926_v27 = vsel %vm923_vm3, %v925_v24, %v921_v20 }
 0x22c   : > { %1158 = vtanh.f32 %v949_v21 }
 0x232   : > { %v1159_v23 = vpop.eup %1158 }
 0x233   : > { %v951_v54 = vsub.f32 %v1578_v45, %v1159_v23 }
 0x235   : > { %v952_v28 = vmul.f32 %v951_v54, %v926_v27 }
 0x237   : > { %v953_v2 = vadd.f32 %v1159_v23, %v952_v28 }
 0x239   : > { %1079 = vst.msk [vmem:[%s1321_s21 + $0x2] sm:$0x3] %vm670_vm11, %v953_v2 }
 0x23a   : > { %957 = vst.msk [vmem:[#allocation2 + $0x2] sm:$0x3] %vm670_vm11, %v953_v2 }
 0x23b PF: > { %s19_s24 = sadd.s32 1, %s1234_s24  }
 0x23c   : > { %p16_p8 = scmp.ge.s32.totalorder %s19_s24, 6  }
 0x23e   :  { %18 = sbr.rel (!%p16_p8) target bundleno = 2 (0x2), region = 94 }
 0x243   :  { %980 = vsyncpa [#allocation4], 1 }
 0x244   :  { %982 = vsyncpa [#allocation4 + $0x1], 1 }
 0x245   :  { %983 = vsyncpa [#allocation6], 1 }

</bundles_post_ra>
